<compile_context>
chip_gen: v5e
topology: v5e:2x2
jax: 0.10.0
libtpu: 0.0.40
codegen_flags: <defaults>
</compile_context>

<pallas_src>
import math
import numpy as np
import jax
import jax.numpy as jnp
from jax.experimental import pallas as pl
from jax.experimental.pallas import tpu as pltpu

LANES = 128


# ----------------------------------------------------------------------------
# Pallas kernel: decode predictions, GT IoU / ignore mask, all loss terms.
# ----------------------------------------------------------------------------
def make_yolo_loss_kernel(bs, num_classes, ignore_threshold, g_pad, block_rows):
    inv_bs = 1.0 / float(bs)
    C = num_classes

    def bce_logits(z, t):
        # Numerically stable BCE-with-logits; equal (up to fp rounding) to the
        # reference's clip(sigmoid)+log formulation for non-saturated logits,
        # and half the transcendental count.
        return jnp.maximum(z, 0.0) - z * t + jnp.log(1.0 + jnp.exp(-jnp.abs(z)))

    def kernel(gt_ref, pred_ref, cls_ref, tgt_ref, tcls_ref, geom_ref,
               loss_ref, iou_ref):
        # ---- dense (block_rows, 128) field views ------------------------
        x_l = pred_ref[0]
        y_l = pred_ref[1]
        w = pred_ref[2]
        h = pred_ref[3]
        conf_l = pred_ref[4]

        mask = tgt_ref[0]
        noobj0 = tgt_ref[1]
        tx = tgt_ref[2]
        ty = tgt_ref[3]
        tw = tgt_ref[4]
        th = tgt_ref[5]
        blsx = tgt_ref[6]
        blsy = tgt_ref[7]

        grid_x = geom_ref[0]
        grid_y = geom_ref[1]
        anchor_w = geom_ref[2]
        anchor_h = geom_ref[3]
        pred_bid = geom_ref[4]

        # ---- decode predicted boxes (grid units) ------------------------
        px = jax.nn.sigmoid(x_l) + grid_x
        py = jax.nn.sigmoid(y_l) + grid_y
        # TODO(synk): exp() is left unclamped to match the PyTorch reference;
        # extreme logits would produce inf/NaN IoU exactly as the reference.
        pw = jnp.exp(w) * anchor_w
        ph = jnp.exp(h) * anchor_h
        px1 = px - 0.5 * pw
        px2 = px + 0.5 * pw
        py1 = py - 0.5 * ph
        py2 = py + 0.5 * ph
        area_b = pw * ph

        # ---- GT IoU + ignore mask ----------------------------------------
        # GT table lives in SMEM; scalars broadcast for free into the vector
        # ops.  Small static loop over padded GT rows (use lax.fori_loop for
        # very large G).
        exceed = jnp.zeros((block_rows, LANES), jnp.float32)
        for gi in range(g_pad):
            gx1 = gt_ref[gi, 0]
            gy1 = gt_ref[gi, 1]
            gx2 = gt_ref[gi, 2]
            gy2 = gt_ref[gi, 3]
            garea = gt_ref[gi, 4]
            gbid = gt_ref[gi, 5]
            gvalid = gt_ref[gi, 6]
            iw = jnp.maximum(jnp.minimum(gx2, px2) - jnp.maximum(gx1, px1), 0.0)
            ih = jnp.maximum(jnp.minimum(gy2, py2) - jnp.maximum(gy1, py1), 0.0)
            inter = iw * ih
            union = garea + area_b - inter
            iou_g = inter / union
            iou_ref[gi] = iou_g
            # only valid GT rows of the same image feed the ignore mask
            use = jnp.logical_and(gvalid > 0.5, gbid == pred_bid)
            exceed = jnp.maximum(exceed, jnp.where(use, iou_g, 0.0))

        noobj = noobj0 * (exceed <= ignore_threshold).astype(jnp.float32)

        # ---- loss terms (scalar factors hoisted out of the maps) ---------
        wm = (2.0 - blsx * blsy) * mask
        lx = jnp.sum(bce_logits(x_l, tx) * wm)
        ly = jnp.sum(bce_logits(y_l, ty) * wm)
        lw = jnp.sum(jnp.square(w - tw) * wm)
        lh = jnp.sum(jnp.square(h - th) * wm)
        lconf = jnp.sum(bce_logits(conf_l, mask) * (mask + noobj))
        lcls = jnp.sum(bce_logits(cls_ref[...], tcls_ref[...]) * mask[None, :, :])

        loss_x = lx * inv_bs
        loss_y = ly * inv_bs
        loss_w = lw * (0.5 * inv_bs)
        loss_h = lh * (0.5 * inv_bs)
        loss_conf = lconf * inv_bs
        loss_cls = lcls * inv_bs
        total = loss_x + loss_y + loss_w + loss_h + loss_conf + loss_cls

        # Per-tile loss partials broadcast across the 128 lanes (lane-dense,
        # unmasked stores); the wrapper sums lane 0 over tiles.  Writing
        # per-tile partials (not a shared accumulator) keeps the grid axis
        # truly "parallel" for v7x's two TensorCores.
        ones_row = jnp.ones((1, LANES), jnp.float32)
        vals = (total, loss_x, loss_y, loss_w, loss_h, loss_conf, loss_cls)
        for r, v in enumerate(vals):
            loss_ref[r:r + 1, :] = v * ones_row
        loss_ref[7:8, :] = jnp.zeros((1, LANES), jnp.float32)

    return kernel


# ----------------------------------------------------------------------------
# get_target: data-dependent GT scatter (label encoding) — numpy glue.
# TODO(synk): bbox_iou is not defined in the source snippet; we assume the
# standard origin-anchored corner-format anchor IoU used by YOLOv3 targets.
# ----------------------------------------------------------------------------
def get_target_np(targets, scaled_anchors, in_w, in_h, num_anchors, num_classes,
                  feature_length):
    bs = len(targets)
    anchor_index = [[0, 1, 2], [3, 4, 5], [6, 7, 8]][feature_length.index(in_w)]
    subtract_index = [0, 3, 6][feature_length.index(in_w)]
    na = num_anchors // 3
    shape = (bs, na, in_h, in_w)
    mask = np.zeros(shape, np.float32)
    noobj_mask = np.ones(shape, np.float32)
    tx = np.zeros(shape, np.float32)
    ty = np.zeros(shape, np.float32)
    tw = np.zeros(shape, np.float32)
    th = np.zeros(shape, np.float32)
    tconf = np.zeros(shape, np.float32)
    tcls = np.zeros(shape + (num_classes,), np.float32)
    blsx = np.zeros(shape, np.float32)
    blsy = np.zeros(shape, np.float32)
    anchors_arr = np.array(scaled_anchors, np.float32)

    for b in range(bs):
        for t in range(targets[b].shape[0]):
            gx = targets[b][t, 0] * in_w
            gy = targets[b][t, 1] * in_h
            gw = targets[b][t, 2] * in_w
            gh = targets[b][t, 3] * in_h
            gi, gj = int(gx), int(gy)
            inter = np.minimum(gw, anchors_arr[:, 0]) * np.minimum(gh, anchors_arr[:, 1])
            union = gw * gh + anchors_arr[:, 0] * anchors_arr[:, 1] - inter
            best_n = int(np.argmax(inter / union))
            if best_n not in anchor_index:
                continue
            if gj < in_h and gi < in_w:
                bn = best_n - subtract_index
                noobj_mask[b, bn, gj, gi] = 0
                mask[b, bn, gj, gi] = 1
                tx[b, bn, gj, gi] = gx - gi
                ty[b, bn, gj, gi] = gy - gj
                tw[b, bn, gj, gi] = math.log(gw / scaled_anchors[best_n][0])
                th[b, bn, gj, gi] = math.log(gh / scaled_anchors[best_n][1])
                blsx[b, bn, gj, gi] = targets[b][t, 2]
                blsy[b, bn, gj, gi] = targets[b][t, 3]
                tconf[b, bn, gj, gi] = 1
                tcls[b, bn, gj, gi, int(targets[b][t, 4])] = 1
    return mask, noobj_mask, tx, ty, tw, th, tconf, tcls, blsx, blsy


# ----------------------------------------------------------------------------
# Wrapper: parameter setup + layout plumbing + pallas_call.
# block_rows is the per-grid-step sublane tile (block_rows*128 cells).  8 is
# fine for tiny demo maps; use ~32-64 on v5e/v6e and ~16-32 on v7x (64 MiB
# VMEM) for real COCO-sized heads.
# ----------------------------------------------------------------------------
def yolo_loss_pallas(x_input, targets, anchors, num_classes, img_size,
                     ignore_threshold=0.5, block_rows=8):
    assert block_rows % 8 == 0
    bs, ch, in_h, in_w = x_input.shape
    num_anchors = len(anchors)
    na = num_anchors // 3
    A = 5 + num_classes
    C = num_classes
    assert ch == na * A
    feature_length = [img_size[0] // 32, img_size[0] // 16, img_size[0] // 8]
    stride_h = img_size[1] / in_h
    stride_w = img_size[0] / in_w
    scaled_anchors = [(aw / stride_w, ah / stride_h) for aw, ah in anchors]
    anchor_index = [[0, 1, 2], [3, 4, 5], [6, 7, 8]][feature_length.index(in_w)]
    sa_used = np.array(scaled_anchors, np.float32)[anchor_index]   # (3, 2)

    N = bs * na * in_h * in_w
    Nb = na * in_h * in_w
    R = pl.cdiv(N, LANES)
    num_tiles = pl.cdiv(R, block_rows)
    R_pad = num_tiles * block_rows
    N_pad = R_pad * LANES
    shape4 = (bs, na, in_h, in_w)

    def to_slab(arr_2d):
        # (F, N) -> zero-padded sublane-dense (F, R_pad, 128)
        f = arr_2d.shape[0]
        out = np.zeros((f, N_pad), np.float32)
        out[:, :N] = arr_2d
        return out.reshape(f, R_pad, LANES)

    # --- prediction slabs: layout plumbing done on device (jnp, not host) ---
    xf = jnp.asarray(x_input, jnp.float32).reshape(bs, na, A, in_h, in_w)
    pred_all = jnp.transpose(xf, (2, 0, 1, 3, 4)).reshape(A, N)
    pred_all = jnp.pad(pred_all, ((0, 0), (0, N_pad - N)))
    pred_box = pred_all[:5].reshape(5, R_pad, LANES)      # x, y, w, h, conf logits
    pred_cls = pred_all[5:].reshape(C, R_pad, LANES)      # class logits

    # --- encoded targets (host scatter, inherently data-dependent) ---
    # TODO(synk): keep a compact (num_gt, fields) table on device and expand it
    # with a small scatter kernel to avoid per-step H2D of full-size slabs.
    (mask, noobj_mask, tx, ty, tw, th, _tconf, tcls, blsx, blsy) = get_target_np(
        targets, scaled_anchors, in_w, in_h, num_anchors, num_classes,
        feature_length)
    tgt_slab = to_slab(np.stack([a.reshape(-1) for a in
                                 (mask, noobj_mask, tx, ty, tw, th, blsx, blsy)], 0))
    tcls_slab = to_slab(np.transpose(tcls, (4, 0, 1, 2, 3)).reshape(C, N))

    # --- geometry slab: grid_x, grid_y, anchor_w, anchor_h, batch_id ---
    grid_x = np.broadcast_to(np.arange(in_w, dtype=np.float32), shape4)
    grid_y = np.broadcast_to(np.arange(in_h, dtype=np.float32)[:, None], shape4)
    anchor_w = np.broadcast_to(sa_used[:, 0][None, :, None, None], shape4)
    anchor_h = np.broadcast_to(sa_used[:, 1][None, :, None, None], shape4)
    pred_bid = np.broadcast_to(
        np.arange(bs, dtype=np.float32)[:, None, None, None], shape4)
    geom_slab = to_slab(np.stack([a.reshape(-1) for a in
                                  (grid_x, grid_y, anchor_w, anchor_h, pred_bid)], 0))

    # --- GT corner-box table (SMEM): [x1, y1, x2, y2, area, batch_id, valid, 0]
    t_max = max([t.shape[0] for t in targets] + [0])
    G = bs * t_max
    G_pad = max(8, int(pl.cdiv(max(G, 1), 8)) * 8)
    gt_arr = np.zeros((G_pad, 8), np.float32)
    for b in range(bs):
        for t in range(targets[b].shape[0]):
            r = b * t_max + t
            gx = targets[b][t, 0] * in_w
            gy = targets[b][t, 1] * in_h
            gw = targets[b][t, 2] * in_w
            gh = targets[b][t, 3] * in_h
            gt_arr[r] = [gx - gw * 0.5, gy - gh * 0.5, gx + gw * 0.5,
                         gy + gh * 0.5, gw * gh, float(b), 1.0, 0.0]

    # --- VMEM budget / cost hints (sized to the chosen tiles) ---
    rows_per_step = 5 + C + 8 + C + 5 + G_pad            # input blocks + iou out block
    step_bytes = rows_per_step * block_rows * LANES * 4 + 8 * LANES * 4
    vmem_limit = int(min(48 * 1024 * 1024, max(8 * 1024 * 1024, 4 * step_bytes)))
    cost = pl.CostEstimate(
        flops=int(N_pad * (60 + 12 * C + 18 * G_pad)),
        transcendentals=int(N_pad * (10 + 2 * C)),
        bytes_accessed=int(4 * (N_pad * (23 + 2 * C + G_pad)
                                + G_pad * 8 + 8 * num_tiles * LANES)))

    kernel = make_yolo_loss_kernel(bs, num_classes, ignore_threshold, G_pad,
                                   block_rows)
    loss_out, iou_out = pl.pallas_call(
        kernel,
        grid=(num_tiles,),
        in_specs=[
            pl.BlockSpec(memory_space=pltpu.MemorySpace.SMEM),               # GT table
            pl.BlockSpec((5, block_rows, LANES), lambda i: (0, i, 0)),       # box/conf logits
            pl.BlockSpec((C, block_rows, LANES), lambda i: (0, i, 0)),       # class logits
            pl.BlockSpec((8, block_rows, LANES), lambda i: (0, i, 0)),       # encoded targets
            pl.BlockSpec((C, block_rows, LANES), lambda i: (0, i, 0)),       # tcls
            pl.BlockSpec((5, block_rows, LANES), lambda i: (0, i, 0)),       # geometry
        ],
        out_specs=(
            pl.BlockSpec((8, LANES), lambda i: (0, i)),                      # loss partials
            pl.BlockSpec((G_pad, block_rows, LANES), lambda i: (0, i, 0)),   # IoU map
        ),
        out_shape=(jax.ShapeDtypeStruct((8, num_tiles * LANES), jnp.float32),
                   jax.ShapeDtypeStruct((G_pad, R_pad, LANES), jnp.float32)),
        compiler_params=pltpu.CompilerParams(
            dimension_semantics=("parallel",),
            vmem_limit_bytes=vmem_limit),
        cost_estimate=cost,
    )(jnp.asarray(gt_arr), pred_box, pred_cls,
      jnp.asarray(tgt_slab), jnp.asarray(tcls_slab), jnp.asarray(geom_slab))

    # --- sum per-tile loss partials; reconstruct the module's all_ious list ---
    totals = jnp.sum(loss_out.reshape(8, num_tiles, LANES)[:, :, 0], axis=1)

    iou_flat = iou_out.reshape(G_pad, R_pad * LANES)[:, :N]
    all_ious = []
    for b in range(bs):
        for t in range(targets[b].shape[0]):
            all_ious.append(
                iou_flat[b * t_max + t, b * Nb:(b + 1) * Nb].reshape(na, in_h, in_w))

    loss = totals[0]
    return (loss, float(totals[1]), float(totals[2]), float(totals[3]),
            float(totals[4]), float(totals[5]), float(totals[6]), all_ious)


# ----------------------------------------------------------------------------
if __name__ == "__main__":
    # Small deterministic config: img_size 128 -> feature maps [4, 8, 16];
    # we feed the 16x16 head (anchor_index [6, 7, 8]).
    anchors = [(3, 4), (5, 9), (10, 7), (9, 19), (19, 14), (18, 37),
               (36, 28), (48, 61), (115, 100)]
    num_classes = 4
    img_size = (128, 128)
    bs, in_h, in_w = 2, 16, 16
    ch = 3 * (5 + num_classes)   # 27

    key = jax.random.PRNGKey(0)
    x = jax.random.normal(key, (bs, ch, in_h, in_w), dtype=jnp.float32) * 0.5

    # deterministic normalized GT boxes: [cx, cy, w, h, class]
    targets = [
        np.array([[0.50, 0.50, 0.60, 0.50, 1],
                  [0.25, 0.30, 0.40, 0.45, 3]], np.float32),
        np.array([[0.70, 0.20, 0.50, 0.60, 0],
                  [0.30, 0.80, 0.90, 0.80, 2],
                  [0.10, 0.10, 0.30, 0.40, 1]], np.float32),
    ]

    out = yolo_loss_pallas(x, targets, anchors, num_classes, img_size)
    loss = jax.block_until_ready(out[0])
    for iou_map in out[7]:
        jax.block_until_ready(iou_map)
    assert bool(jnp.isfinite(loss)), "loss is not finite"
    print("KERNEL_OK")
</pallas_src>

<mosaic_0001>
module attributes {stable_mosaic.version = 11 : i64} {
  func.func @kernel(%arg0: i32, %arg1: memref<8x8xf32, #tpu.memory_space<smem>>, %arg2: memref<5x8x128xf32, #tpu.memory_space<vmem>>, %arg3: memref<4x8x128xf32, #tpu.memory_space<vmem>>, %arg4: memref<8x8x128xf32, #tpu.memory_space<vmem>>, %arg5: memref<4x8x128xf32, #tpu.memory_space<vmem>>, %arg6: memref<5x8x128xf32, #tpu.memory_space<vmem>>, %arg7: memref<8x128xf32, #tpu.memory_space<vmem>>, %arg8: memref<8x8x128xf32, #tpu.memory_space<vmem>>) attributes {dimension_semantics = [#tpu.dimension_semantics<parallel>], iteration_bounds = array<i64: 2>, scalar_prefetch = 0 : i64, scratch_operands = 0 : i64, tpu.core_type = #tpu.core_type<tc>, window_params = [{transform_indices = @transform_0, window_bounds = array<i64: 8, 8>}, {transform_indices = @transform_1, window_bounds = array<i64: 5, 8, 128>}, {transform_indices = @transform_2, window_bounds = array<i64: 4, 8, 128>}, {transform_indices = @transform_3, window_bounds = array<i64: 8, 8, 128>}, {transform_indices = @transform_4, window_bounds = array<i64: 4, 8, 128>}, {transform_indices = @transform_5, window_bounds = array<i64: 5, 8, 128>}, {transform_indices = @transform_6, window_bounds = array<i64: 8, 128>}, {transform_indices = @transform_7, window_bounds = array<i64: 8, 8, 128>}]} {
    %c0 = arith.constant 0 : index
    %c0_0 = arith.constant 0 : index
    %c0_1 = arith.constant 0 : index
    %0 = vector.load %arg2[%c0, %c0_0, %c0_1] : memref<5x8x128xf32, #tpu.memory_space<vmem>>, vector<1x8x128xf32>
    %1 = vector.shape_cast %0 : vector<1x8x128xf32> to vector<8x128xf32>
    %c1 = arith.constant 1 : index
    %c0_2 = arith.constant 0 : index
    %c0_3 = arith.constant 0 : index
    %2 = vector.load %arg2[%c1, %c0_2, %c0_3] : memref<5x8x128xf32, #tpu.memory_space<vmem>>, vector<1x8x128xf32>
    %3 = vector.shape_cast %2 : vector<1x8x128xf32> to vector<8x128xf32>
    %c2 = arith.constant 2 : index
    %c0_4 = arith.constant 0 : index
    %c0_5 = arith.constant 0 : index
    %4 = vector.load %arg2[%c2, %c0_4, %c0_5] : memref<5x8x128xf32, #tpu.memory_space<vmem>>, vector<1x8x128xf32>
    %5 = vector.shape_cast %4 : vector<1x8x128xf32> to vector<8x128xf32>
    %c3 = arith.constant 3 : index
    %c0_6 = arith.constant 0 : index
    %c0_7 = arith.constant 0 : index
    %6 = vector.load %arg2[%c3, %c0_6, %c0_7] : memref<5x8x128xf32, #tpu.memory_space<vmem>>, vector<1x8x128xf32>
    %7 = vector.shape_cast %6 : vector<1x8x128xf32> to vector<8x128xf32>
    %c4 = arith.constant 4 : index
    %c0_8 = arith.constant 0 : index
    %c0_9 = arith.constant 0 : index
    %8 = vector.load %arg2[%c4, %c0_8, %c0_9] : memref<5x8x128xf32, #tpu.memory_space<vmem>>, vector<1x8x128xf32>
    %9 = vector.shape_cast %8 : vector<1x8x128xf32> to vector<8x128xf32>
    %c0_10 = arith.constant 0 : index
    %c0_11 = arith.constant 0 : index
    %c0_12 = arith.constant 0 : index
    %10 = vector.load %arg4[%c0_10, %c0_11, %c0_12] : memref<8x8x128xf32, #tpu.memory_space<vmem>>, vector<1x8x128xf32>
    %11 = vector.shape_cast %10 : vector<1x8x128xf32> to vector<8x128xf32>
    %c1_13 = arith.constant 1 : index
    %c0_14 = arith.constant 0 : index
    %c0_15 = arith.constant 0 : index
    %12 = vector.load %arg4[%c1_13, %c0_14, %c0_15] : memref<8x8x128xf32, #tpu.memory_space<vmem>>, vector<1x8x128xf32>
    %13 = vector.shape_cast %12 : vector<1x8x128xf32> to vector<8x128xf32>
    %c2_16 = arith.constant 2 : index
    %c0_17 = arith.constant 0 : index
    %c0_18 = arith.constant 0 : index
    %14 = vector.load %arg4[%c2_16, %c0_17, %c0_18] : memref<8x8x128xf32, #tpu.memory_space<vmem>>, vector<1x8x128xf32>
    %15 = vector.shape_cast %14 : vector<1x8x128xf32> to vector<8x128xf32>
    %c3_19 = arith.constant 3 : index
    %c0_20 = arith.constant 0 : index
    %c0_21 = arith.constant 0 : index
    %16 = vector.load %arg4[%c3_19, %c0_20, %c0_21] : memref<8x8x128xf32, #tpu.memory_space<vmem>>, vector<1x8x128xf32>
    %17 = vector.shape_cast %16 : vector<1x8x128xf32> to vector<8x128xf32>
    %c4_22 = arith.constant 4 : index
    %c0_23 = arith.constant 0 : index
    %c0_24 = arith.constant 0 : index
    %18 = vector.load %arg4[%c4_22, %c0_23, %c0_24] : memref<8x8x128xf32, #tpu.memory_space<vmem>>, vector<1x8x128xf32>
    %19 = vector.shape_cast %18 : vector<1x8x128xf32> to vector<8x128xf32>
    %c5 = arith.constant 5 : index
    %c0_25 = arith.constant 0 : index
    %c0_26 = arith.constant 0 : index
    %20 = vector.load %arg4[%c5, %c0_25, %c0_26] : memref<8x8x128xf32, #tpu.memory_space<vmem>>, vector<1x8x128xf32>
    %21 = vector.shape_cast %20 : vector<1x8x128xf32> to vector<8x128xf32>
    %c6 = arith.constant 6 : index
    %c0_27 = arith.constant 0 : index
    %c0_28 = arith.constant 0 : index
    %22 = vector.load %arg4[%c6, %c0_27, %c0_28] : memref<8x8x128xf32, #tpu.memory_space<vmem>>, vector<1x8x128xf32>
    %23 = vector.shape_cast %22 : vector<1x8x128xf32> to vector<8x128xf32>
    %c7 = arith.constant 7 : index
    %c0_29 = arith.constant 0 : index
    %c0_30 = arith.constant 0 : index
    %24 = vector.load %arg4[%c7, %c0_29, %c0_30] : memref<8x8x128xf32, #tpu.memory_space<vmem>>, vector<1x8x128xf32>
    %25 = vector.shape_cast %24 : vector<1x8x128xf32> to vector<8x128xf32>
    %c0_31 = arith.constant 0 : index
    %c0_32 = arith.constant 0 : index
    %c0_33 = arith.constant 0 : index
    %26 = vector.load %arg6[%c0_31, %c0_32, %c0_33] : memref<5x8x128xf32, #tpu.memory_space<vmem>>, vector<1x8x128xf32>
    %27 = vector.shape_cast %26 : vector<1x8x128xf32> to vector<8x128xf32>
    %c1_34 = arith.constant 1 : index
    %c0_35 = arith.constant 0 : index
    %c0_36 = arith.constant 0 : index
    %28 = vector.load %arg6[%c1_34, %c0_35, %c0_36] : memref<5x8x128xf32, #tpu.memory_space<vmem>>, vector<1x8x128xf32>
    %29 = vector.shape_cast %28 : vector<1x8x128xf32> to vector<8x128xf32>
    %c2_37 = arith.constant 2 : index
    %c0_38 = arith.constant 0 : index
    %c0_39 = arith.constant 0 : index
    %30 = vector.load %arg6[%c2_37, %c0_38, %c0_39] : memref<5x8x128xf32, #tpu.memory_space<vmem>>, vector<1x8x128xf32>
    %31 = vector.shape_cast %30 : vector<1x8x128xf32> to vector<8x128xf32>
    %c3_40 = arith.constant 3 : index
    %c0_41 = arith.constant 0 : index
    %c0_42 = arith.constant 0 : index
    %32 = vector.load %arg6[%c3_40, %c0_41, %c0_42] : memref<5x8x128xf32, #tpu.memory_space<vmem>>, vector<1x8x128xf32>
    %33 = vector.shape_cast %32 : vector<1x8x128xf32> to vector<8x128xf32>
    %c4_43 = arith.constant 4 : index
    %c0_44 = arith.constant 0 : index
    %c0_45 = arith.constant 0 : index
    %34 = vector.load %arg6[%c4_43, %c0_44, %c0_45] : memref<5x8x128xf32, #tpu.memory_space<vmem>>, vector<1x8x128xf32>
    %35 = vector.shape_cast %34 : vector<1x8x128xf32> to vector<8x128xf32>
    %36 = arith.negf %1 : vector<8x128xf32>
    %37 = math.exp %36 : vector<8x128xf32>
    %cst = arith.constant 1.000000e+00 : f32
    %38 = vector.broadcast %cst : f32 to vector<8x128xf32>
    %39 = arith.addf %38, %37 : vector<8x128xf32>
    %40 = arith.divf %38, %39 : vector<8x128xf32>
    %41 = arith.addf %40, %27 : vector<8x128xf32>
    %42 = arith.negf %3 : vector<8x128xf32>
    %43 = math.exp %42 : vector<8x128xf32>
    %cst_46 = arith.constant 1.000000e+00 : f32
    %44 = vector.broadcast %cst_46 : f32 to vector<8x128xf32>
    %45 = arith.addf %44, %43 : vector<8x128xf32>
    %46 = arith.divf %44, %45 : vector<8x128xf32>
    %47 = arith.addf %46, %29 : vector<8x128xf32>
    %48 = math.exp %5 : vector<8x128xf32>
    %49 = arith.mulf %48, %31 : vector<8x128xf32>
    %50 = math.exp %7 : vector<8x128xf32>
    %51 = arith.mulf %50, %33 : vector<8x128xf32>
    %cst_47 = arith.constant 5.000000e-01 : f32
    %52 = vector.broadcast %cst_47 : f32 to vector<8x128xf32>
    %53 = arith.mulf %52, %49 : vector<8x128xf32>
    %54 = arith.subf %41, %53 : vector<8x128xf32>
    %cst_48 = arith.constant 5.000000e-01 : f32
    %55 = vector.broadcast %cst_48 : f32 to vector<8x128xf32>
    %56 = arith.mulf %55, %49 : vector<8x128xf32>
    %57 = arith.addf %41, %56 : vector<8x128xf32>
    %cst_49 = arith.constant 5.000000e-01 : f32
    %58 = vector.broadcast %cst_49 : f32 to vector<8x128xf32>
    %59 = arith.mulf %58, %51 : vector<8x128xf32>
    %60 = arith.subf %47, %59 : vector<8x128xf32>
    %cst_50 = arith.constant 5.000000e-01 : f32
    %61 = vector.broadcast %cst_50 : f32 to vector<8x128xf32>
    %62 = arith.mulf %61, %51 : vector<8x128xf32>
    %63 = arith.addf %47, %62 : vector<8x128xf32>
    %64 = arith.mulf %49, %51 : vector<8x128xf32>
    %cst_51 = arith.constant 0.000000e+00 : f32
    %65 = vector.broadcast %cst_51 : f32 to vector<8x128xf32>
    %c0_52 = arith.constant 0 : index
    %c0_53 = arith.constant 0 : index
    %66 = memref.load %arg1[%c0_52, %c0_53] : memref<8x8xf32, #tpu.memory_space<smem>>
    %c0_54 = arith.constant 0 : index
    %c1_55 = arith.constant 1 : index
    %67 = memref.load %arg1[%c0_54, %c1_55] : memref<8x8xf32, #tpu.memory_space<smem>>
    %c0_56 = arith.constant 0 : index
    %c2_57 = arith.constant 2 : index
    %68 = memref.load %arg1[%c0_56, %c2_57] : memref<8x8xf32, #tpu.memory_space<smem>>
    %c0_58 = arith.constant 0 : index
    %c3_59 = arith.constant 3 : index
    %69 = memref.load %arg1[%c0_58, %c3_59] : memref<8x8xf32, #tpu.memory_space<smem>>
    %c0_60 = arith.constant 0 : index
    %c4_61 = arith.constant 4 : index
    %70 = memref.load %arg1[%c0_60, %c4_61] : memref<8x8xf32, #tpu.memory_space<smem>>
    %c0_62 = arith.constant 0 : index
    %c5_63 = arith.constant 5 : index
    %71 = memref.load %arg1[%c0_62, %c5_63] : memref<8x8xf32, #tpu.memory_space<smem>>
    %c0_64 = arith.constant 0 : index
    %c6_65 = arith.constant 6 : index
    %72 = memref.load %arg1[%c0_64, %c6_65] : memref<8x8xf32, #tpu.memory_space<smem>>
    %73 = vector.broadcast %68 : f32 to vector<8x128xf32>
    %74 = arith.minimumf %73, %57 : vector<8x128xf32>
    %75 = vector.broadcast %66 : f32 to vector<8x128xf32>
    %76 = arith.maximumf %75, %54 : vector<8x128xf32>
    %77 = arith.subf %74, %76 : vector<8x128xf32>
    %cst_66 = arith.constant 0.000000e+00 : f32
    %78 = vector.broadcast %cst_66 : f32 to vector<8x128xf32>
    %79 = arith.maximumf %77, %78 : vector<8x128xf32>
    %80 = vector.broadcast %69 : f32 to vector<8x128xf32>
    %81 = arith.minimumf %80, %63 : vector<8x128xf32>
    %82 = vector.broadcast %67 : f32 to vector<8x128xf32>
    %83 = arith.maximumf %82, %60 : vector<8x128xf32>
    %84 = arith.subf %81, %83 : vector<8x128xf32>
    %cst_67 = arith.constant 0.000000e+00 : f32
    %85 = vector.broadcast %cst_67 : f32 to vector<8x128xf32>
    %86 = arith.maximumf %84, %85 : vector<8x128xf32>
    %87 = arith.mulf %79, %86 : vector<8x128xf32>
    %88 = vector.broadcast %70 : f32 to vector<8x128xf32>
    %89 = arith.addf %88, %64 : vector<8x128xf32>
    %90 = arith.subf %89, %87 : vector<8x128xf32>
    %91 = arith.divf %87, %90 : vector<8x128xf32>
    %c0_68 = arith.constant 0 : index
    %c0_69 = arith.constant 0 : index
    %c0_70 = arith.constant 0 : index
    %92 = vector.load %arg8[%c0_68, %c0_69, %c0_70] : memref<8x8x128xf32, #tpu.memory_space<vmem>>, vector<1x8x128xf32>
    %93 = vector.shape_cast %92 : vector<1x8x128xf32> to vector<8x128xf32>
    %94 = vector.shape_cast %91 : vector<8x128xf32> to vector<1x8x128xf32>
    tpu.vector_store %arg8[%c0_68, %c0_69, %c0_70], %94 {strides = array<i32>} : memref<8x8x128xf32, #tpu.memory_space<vmem>>, vector<1x8x128xf32>,
    %cst_71 = arith.constant 5.000000e-01 : f32
    %95 = arith.cmpf ogt, %72, %cst_71 : f32
    %96 = vector.broadcast %71 : f32 to vector<8x128xf32>
    %97 = arith.cmpf oeq, %96, %35 : vector<8x128xf32>
    %98 = vector.broadcast %95 : i1 to vector<8x128xi1>
    %99 = arith.andi %98, %97 : vector<8x128xi1>
    %cst_72 = arith.constant 0.000000e+00 : f32
    %100 = vector.broadcast %cst_72 : f32 to vector<8x128xf32>
    %101 = arith.select %99, %91, %100 : vector<8x128xi1>, vector<8x128xf32>
    %102 = arith.maximumf %65, %101 : vector<8x128xf32>
    %c1_73 = arith.constant 1 : index
    %c0_74 = arith.constant 0 : index
    %103 = memref.load %arg1[%c1_73, %c0_74] : memref<8x8xf32, #tpu.memory_space<smem>>
    %c1_75 = arith.constant 1 : index
    %c1_76 = arith.constant 1 : index
    %104 = memref.load %arg1[%c1_75, %c1_76] : memref<8x8xf32, #tpu.memory_space<smem>>
    %c1_77 = arith.constant 1 : index
    %c2_78 = arith.constant 2 : index
    %105 = memref.load %arg1[%c1_77, %c2_78] : memref<8x8xf32, #tpu.memory_space<smem>>
    %c1_79 = arith.constant 1 : index
    %c3_80 = arith.constant 3 : index
    %106 = memref.load %arg1[%c1_79, %c3_80] : memref<8x8xf32, #tpu.memory_space<smem>>
    %c1_81 = arith.constant 1 : index
    %c4_82 = arith.constant 4 : index
    %107 = memref.load %arg1[%c1_81, %c4_82] : memref<8x8xf32, #tpu.memory_space<smem>>
    %c1_83 = arith.constant 1 : index
    %c5_84 = arith.constant 5 : index
    %108 = memref.load %arg1[%c1_83, %c5_84] : memref<8x8xf32, #tpu.memory_space<smem>>
    %c1_85 = arith.constant 1 : index
    %c6_86 = arith.constant 6 : index
    %109 = memref.load %arg1[%c1_85, %c6_86] : memref<8x8xf32, #tpu.memory_space<smem>>
    %110 = vector.broadcast %105 : f32 to vector<8x128xf32>
    %111 = arith.minimumf %110, %57 : vector<8x128xf32>
    %112 = vector.broadcast %103 : f32 to vector<8x128xf32>
    %113 = arith.maximumf %112, %54 : vector<8x128xf32>
    %114 = arith.subf %111, %113 : vector<8x128xf32>
    %cst_87 = arith.constant 0.000000e+00 : f32
    %115 = vector.broadcast %cst_87 : f32 to vector<8x128xf32>
    %116 = arith.maximumf %114, %115 : vector<8x128xf32>
    %117 = vector.broadcast %106 : f32 to vector<8x128xf32>
    %118 = arith.minimumf %117, %63 : vector<8x128xf32>
    %119 = vector.broadcast %104 : f32 to vector<8x128xf32>
    %120 = arith.maximumf %119, %60 : vector<8x128xf32>
    %121 = arith.subf %118, %120 : vector<8x128xf32>
    %cst_88 = arith.constant 0.000000e+00 : f32
    %122 = vector.broadcast %cst_88 : f32 to vector<8x128xf32>
    %123 = arith.maximumf %121, %122 : vector<8x128xf32>
    %124 = arith.mulf %116, %123 : vector<8x128xf32>
    %125 = vector.broadcast %107 : f32 to vector<8x128xf32>
    %126 = arith.addf %125, %64 : vector<8x128xf32>
    %127 = arith.subf %126, %124 : vector<8x128xf32>
    %128 = arith.divf %124, %127 : vector<8x128xf32>
    %c1_89 = arith.constant 1 : index
    %c0_90 = arith.constant 0 : index
    %c0_91 = arith.constant 0 : index
    %129 = vector.load %arg8[%c1_89, %c0_90, %c0_91] : memref<8x8x128xf32, #tpu.memory_space<vmem>>, vector<1x8x128xf32>
    %130 = vector.shape_cast %129 : vector<1x8x128xf32> to vector<8x128xf32>
    %131 = vector.shape_cast %128 : vector<8x128xf32> to vector<1x8x128xf32>
    tpu.vector_store %arg8[%c1_89, %c0_90, %c0_91], %131 {strides = array<i32>} : memref<8x8x128xf32, #tpu.memory_space<vmem>>, vector<1x8x128xf32>,
    %cst_92 = arith.constant 5.000000e-01 : f32
    %132 = arith.cmpf ogt, %109, %cst_92 : f32
    %133 = vector.broadcast %108 : f32 to vector<8x128xf32>
    %134 = arith.cmpf oeq, %133, %35 : vector<8x128xf32>
    %135 = vector.broadcast %132 : i1 to vector<8x128xi1>
    %136 = arith.andi %135, %134 : vector<8x128xi1>
    %cst_93 = arith.constant 0.000000e+00 : f32
    %137 = vector.broadcast %cst_93 : f32 to vector<8x128xf32>
    %138 = arith.select %136, %128, %137 : vector<8x128xi1>, vector<8x128xf32>
    %139 = arith.maximumf %102, %138 : vector<8x128xf32>
    %c2_94 = arith.constant 2 : index
    %c0_95 = arith.constant 0 : index
    %140 = memref.load %arg1[%c2_94, %c0_95] : memref<8x8xf32, #tpu.memory_space<smem>>
    %c2_96 = arith.constant 2 : index
    %c1_97 = arith.constant 1 : index
    %141 = memref.load %arg1[%c2_96, %c1_97] : memref<8x8xf32, #tpu.memory_space<smem>>
    %c2_98 = arith.constant 2 : index
    %c2_99 = arith.constant 2 : index
    %142 = memref.load %arg1[%c2_98, %c2_99] : memref<8x8xf32, #tpu.memory_space<smem>>
    %c2_100 = arith.constant 2 : index
    %c3_101 = arith.constant 3 : index
    %143 = memref.load %arg1[%c2_100, %c3_101] : memref<8x8xf32, #tpu.memory_space<smem>>
    %c2_102 = arith.constant 2 : index
    %c4_103 = arith.constant 4 : index
    %144 = memref.load %arg1[%c2_102, %c4_103] : memref<8x8xf32, #tpu.memory_space<smem>>
    %c2_104 = arith.constant 2 : index
    %c5_105 = arith.constant 5 : index
    %145 = memref.load %arg1[%c2_104, %c5_105] : memref<8x8xf32, #tpu.memory_space<smem>>
    %c2_106 = arith.constant 2 : index
    %c6_107 = arith.constant 6 : index
    %146 = memref.load %arg1[%c2_106, %c6_107] : memref<8x8xf32, #tpu.memory_space<smem>>
    %147 = vector.broadcast %142 : f32 to vector<8x128xf32>
    %148 = arith.minimumf %147, %57 : vector<8x128xf32>
    %149 = vector.broadcast %140 : f32 to vector<8x128xf32>
    %150 = arith.maximumf %149, %54 : vector<8x128xf32>
    %151 = arith.subf %148, %150 : vector<8x128xf32>
    %cst_108 = arith.constant 0.000000e+00 : f32
    %152 = vector.broadcast %cst_108 : f32 to vector<8x128xf32>
    %153 = arith.maximumf %151, %152 : vector<8x128xf32>
    %154 = vector.broadcast %143 : f32 to vector<8x128xf32>
    %155 = arith.minimumf %154, %63 : vector<8x128xf32>
    %156 = vector.broadcast %141 : f32 to vector<8x128xf32>
    %157 = arith.maximumf %156, %60 : vector<8x128xf32>
    %158 = arith.subf %155, %157 : vector<8x128xf32>
    %cst_109 = arith.constant 0.000000e+00 : f32
    %159 = vector.broadcast %cst_109 : f32 to vector<8x128xf32>
    %160 = arith.maximumf %158, %159 : vector<8x128xf32>
    %161 = arith.mulf %153, %160 : vector<8x128xf32>
    %162 = vector.broadcast %144 : f32 to vector<8x128xf32>
    %163 = arith.addf %162, %64 : vector<8x128xf32>
    %164 = arith.subf %163, %161 : vector<8x128xf32>
    %165 = arith.divf %161, %164 : vector<8x128xf32>
    %c2_110 = arith.constant 2 : index
    %c0_111 = arith.constant 0 : index
    %c0_112 = arith.constant 0 : index
    %166 = vector.load %arg8[%c2_110, %c0_111, %c0_112] : memref<8x8x128xf32, #tpu.memory_space<vmem>>, vector<1x8x128xf32>
    %167 = vector.shape_cast %166 : vector<1x8x128xf32> to vector<8x128xf32>
    %168 = vector.shape_cast %165 : vector<8x128xf32> to vector<1x8x128xf32>
    tpu.vector_store %arg8[%c2_110, %c0_111, %c0_112], %168 {strides = array<i32>} : memref<8x8x128xf32, #tpu.memory_space<vmem>>, vector<1x8x128xf32>,
    %cst_113 = arith.constant 5.000000e-01 : f32
    %169 = arith.cmpf ogt, %146, %cst_113 : f32
    %170 = vector.broadcast %145 : f32 to vector<8x128xf32>
    %171 = arith.cmpf oeq, %170, %35 : vector<8x128xf32>
    %172 = vector.broadcast %169 : i1 to vector<8x128xi1>
    %173 = arith.andi %172, %171 : vector<8x128xi1>
    %cst_114 = arith.constant 0.000000e+00 : f32
    %174 = vector.broadcast %cst_114 : f32 to vector<8x128xf32>
    %175 = arith.select %173, %165, %174 : vector<8x128xi1>, vector<8x128xf32>
    %176 = arith.maximumf %139, %175 : vector<8x128xf32>
    %c3_115 = arith.constant 3 : index
    %c0_116 = arith.constant 0 : index
    %177 = memref.load %arg1[%c3_115, %c0_116] : memref<8x8xf32, #tpu.memory_space<smem>>
    %c3_117 = arith.constant 3 : index
    %c1_118 = arith.constant 1 : index
    %178 = memref.load %arg1[%c3_117, %c1_118] : memref<8x8xf32, #tpu.memory_space<smem>>
    %c3_119 = arith.constant 3 : index
    %c2_120 = arith.constant 2 : index
    %179 = memref.load %arg1[%c3_119, %c2_120] : memref<8x8xf32, #tpu.memory_space<smem>>
    %c3_121 = arith.constant 3 : index
    %c3_122 = arith.constant 3 : index
    %180 = memref.load %arg1[%c3_121, %c3_122] : memref<8x8xf32, #tpu.memory_space<smem>>
    %c3_123 = arith.constant 3 : index
    %c4_124 = arith.constant 4 : index
    %181 = memref.load %arg1[%c3_123, %c4_124] : memref<8x8xf32, #tpu.memory_space<smem>>
    %c3_125 = arith.constant 3 : index
    %c5_126 = arith.constant 5 : index
    %182 = memref.load %arg1[%c3_125, %c5_126] : memref<8x8xf32, #tpu.memory_space<smem>>
    %c3_127 = arith.constant 3 : index
    %c6_128 = arith.constant 6 : index
    %183 = memref.load %arg1[%c3_127, %c6_128] : memref<8x8xf32, #tpu.memory_space<smem>>
    %184 = vector.broadcast %179 : f32 to vector<8x128xf32>
    %185 = arith.minimumf %184, %57 : vector<8x128xf32>
    %186 = vector.broadcast %177 : f32 to vector<8x128xf32>
    %187 = arith.maximumf %186, %54 : vector<8x128xf32>
    %188 = arith.subf %185, %187 : vector<8x128xf32>
    %cst_129 = arith.constant 0.000000e+00 : f32
    %189 = vector.broadcast %cst_129 : f32 to vector<8x128xf32>
    %190 = arith.maximumf %188, %189 : vector<8x128xf32>
    %191 = vector.broadcast %180 : f32 to vector<8x128xf32>
    %192 = arith.minimumf %191, %63 : vector<8x128xf32>
    %193 = vector.broadcast %178 : f32 to vector<8x128xf32>
    %194 = arith.maximumf %193, %60 : vector<8x128xf32>
    %195 = arith.subf %192, %194 : vector<8x128xf32>
    %cst_130 = arith.constant 0.000000e+00 : f32
    %196 = vector.broadcast %cst_130 : f32 to vector<8x128xf32>
    %197 = arith.maximumf %195, %196 : vector<8x128xf32>
    %198 = arith.mulf %190, %197 : vector<8x128xf32>
    %199 = vector.broadcast %181 : f32 to vector<8x128xf32>
    %200 = arith.addf %199, %64 : vector<8x128xf32>
    %201 = arith.subf %200, %198 : vector<8x128xf32>
    %202 = arith.divf %198, %201 : vector<8x128xf32>
    %c3_131 = arith.constant 3 : index
    %c0_132 = arith.constant 0 : index
    %c0_133 = arith.constant 0 : index
    %203 = vector.load %arg8[%c3_131, %c0_132, %c0_133] : memref<8x8x128xf32, #tpu.memory_space<vmem>>, vector<1x8x128xf32>
    %204 = vector.shape_cast %203 : vector<1x8x128xf32> to vector<8x128xf32>
    %205 = vector.shape_cast %202 : vector<8x128xf32> to vector<1x8x128xf32>
    tpu.vector_store %arg8[%c3_131, %c0_132, %c0_133], %205 {strides = array<i32>} : memref<8x8x128xf32, #tpu.memory_space<vmem>>, vector<1x8x128xf32>,
    %cst_134 = arith.constant 5.000000e-01 : f32
    %206 = arith.cmpf ogt, %183, %cst_134 : f32
    %207 = vector.broadcast %182 : f32 to vector<8x128xf32>
    %208 = arith.cmpf oeq, %207, %35 : vector<8x128xf32>
    %209 = vector.broadcast %206 : i1 to vector<8x128xi1>
    %210 = arith.andi %209, %208 : vector<8x128xi1>
    %cst_135 = arith.constant 0.000000e+00 : f32
    %211 = vector.broadcast %cst_135 : f32 to vector<8x128xf32>
    %212 = arith.select %210, %202, %211 : vector<8x128xi1>, vector<8x128xf32>
    %213 = arith.maximumf %176, %212 : vector<8x128xf32>
    %c4_136 = arith.constant 4 : index
    %c0_137 = arith.constant 0 : index
    %214 = memref.load %arg1[%c4_136, %c0_137] : memref<8x8xf32, #tpu.memory_space<smem>>
    %c4_138 = arith.constant 4 : index
    %c1_139 = arith.constant 1 : index
    %215 = memref.load %arg1[%c4_138, %c1_139] : memref<8x8xf32, #tpu.memory_space<smem>>
    %c4_140 = arith.constant 4 : index
    %c2_141 = arith.constant 2 : index
    %216 = memref.load %arg1[%c4_140, %c2_141] : memref<8x8xf32, #tpu.memory_space<smem>>
    %c4_142 = arith.constant 4 : index
    %c3_143 = arith.constant 3 : index
    %217 = memref.load %arg1[%c4_142, %c3_143] : memref<8x8xf32, #tpu.memory_space<smem>>
    %c4_144 = arith.constant 4 : index
    %c4_145 = arith.constant 4 : index
    %218 = memref.load %arg1[%c4_144, %c4_145] : memref<8x8xf32, #tpu.memory_space<smem>>
    %c4_146 = arith.constant 4 : index
    %c5_147 = arith.constant 5 : index
    %219 = memref.load %arg1[%c4_146, %c5_147] : memref<8x8xf32, #tpu.memory_space<smem>>
    %c4_148 = arith.constant 4 : index
    %c6_149 = arith.constant 6 : index
    %220 = memref.load %arg1[%c4_148, %c6_149] : memref<8x8xf32, #tpu.memory_space<smem>>
    %221 = vector.broadcast %216 : f32 to vector<8x128xf32>
    %222 = arith.minimumf %221, %57 : vector<8x128xf32>
    %223 = vector.broadcast %214 : f32 to vector<8x128xf32>
    %224 = arith.maximumf %223, %54 : vector<8x128xf32>
    %225 = arith.subf %222, %224 : vector<8x128xf32>
    %cst_150 = arith.constant 0.000000e+00 : f32
    %226 = vector.broadcast %cst_150 : f32 to vector<8x128xf32>
    %227 = arith.maximumf %225, %226 : vector<8x128xf32>
    %228 = vector.broadcast %217 : f32 to vector<8x128xf32>
    %229 = arith.minimumf %228, %63 : vector<8x128xf32>
    %230 = vector.broadcast %215 : f32 to vector<8x128xf32>
    %231 = arith.maximumf %230, %60 : vector<8x128xf32>
    %232 = arith.subf %229, %231 : vector<8x128xf32>
    %cst_151 = arith.constant 0.000000e+00 : f32
    %233 = vector.broadcast %cst_151 : f32 to vector<8x128xf32>
    %234 = arith.maximumf %232, %233 : vector<8x128xf32>
    %235 = arith.mulf %227, %234 : vector<8x128xf32>
    %236 = vector.broadcast %218 : f32 to vector<8x128xf32>
    %237 = arith.addf %236, %64 : vector<8x128xf32>
    %238 = arith.subf %237, %235 : vector<8x128xf32>
    %239 = arith.divf %235, %238 : vector<8x128xf32>
    %c4_152 = arith.constant 4 : index
    %c0_153 = arith.constant 0 : index
    %c0_154 = arith.constant 0 : index
    %240 = vector.load %arg8[%c4_152, %c0_153, %c0_154] : memref<8x8x128xf32, #tpu.memory_space<vmem>>, vector<1x8x128xf32>
    %241 = vector.shape_cast %240 : vector<1x8x128xf32> to vector<8x128xf32>
    %242 = vector.shape_cast %239 : vector<8x128xf32> to vector<1x8x128xf32>
    tpu.vector_store %arg8[%c4_152, %c0_153, %c0_154], %242 {strides = array<i32>} : memref<8x8x128xf32, #tpu.memory_space<vmem>>, vector<1x8x128xf32>,
    %cst_155 = arith.constant 5.000000e-01 : f32
    %243 = arith.cmpf ogt, %220, %cst_155 : f32
    %244 = vector.broadcast %219 : f32 to vector<8x128xf32>
    %245 = arith.cmpf oeq, %244, %35 : vector<8x128xf32>
    %246 = vector.broadcast %243 : i1 to vector<8x128xi1>
    %247 = arith.andi %246, %245 : vector<8x128xi1>
    %cst_156 = arith.constant 0.000000e+00 : f32
    %248 = vector.broadcast %cst_156 : f32 to vector<8x128xf32>
    %249 = arith.select %247, %239, %248 : vector<8x128xi1>, vector<8x128xf32>
    %250 = arith.maximumf %213, %249 : vector<8x128xf32>
    %c5_157 = arith.constant 5 : index
    %c0_158 = arith.constant 0 : index
    %251 = memref.load %arg1[%c5_157, %c0_158] : memref<8x8xf32, #tpu.memory_space<smem>>
    %c5_159 = arith.constant 5 : index
    %c1_160 = arith.constant 1 : index
    %252 = memref.load %arg1[%c5_159, %c1_160] : memref<8x8xf32, #tpu.memory_space<smem>>
    %c5_161 = arith.constant 5 : index
    %c2_162 = arith.constant 2 : index
    %253 = memref.load %arg1[%c5_161, %c2_162] : memref<8x8xf32, #tpu.memory_space<smem>>
    %c5_163 = arith.constant 5 : index
    %c3_164 = arith.constant 3 : index
    %254 = memref.load %arg1[%c5_163, %c3_164] : memref<8x8xf32, #tpu.memory_space<smem>>
    %c5_165 = arith.constant 5 : index
    %c4_166 = arith.constant 4 : index
    %255 = memref.load %arg1[%c5_165, %c4_166] : memref<8x8xf32, #tpu.memory_space<smem>>
    %c5_167 = arith.constant 5 : index
    %c5_168 = arith.constant 5 : index
    %256 = memref.load %arg1[%c5_167, %c5_168] : memref<8x8xf32, #tpu.memory_space<smem>>
    %c5_169 = arith.constant 5 : index
    %c6_170 = arith.constant 6 : index
    %257 = memref.load %arg1[%c5_169, %c6_170] : memref<8x8xf32, #tpu.memory_space<smem>>
    %258 = vector.broadcast %253 : f32 to vector<8x128xf32>
    %259 = arith.minimumf %258, %57 : vector<8x128xf32>
    %260 = vector.broadcast %251 : f32 to vector<8x128xf32>
    %261 = arith.maximumf %260, %54 : vector<8x128xf32>
    %262 = arith.subf %259, %261 : vector<8x128xf32>
    %cst_171 = arith.constant 0.000000e+00 : f32
    %263 = vector.broadcast %cst_171 : f32 to vector<8x128xf32>
    %264 = arith.maximumf %262, %263 : vector<8x128xf32>
    %265 = vector.broadcast %254 : f32 to vector<8x128xf32>
    %266 = arith.minimumf %265, %63 : vector<8x128xf32>
    %267 = vector.broadcast %252 : f32 to vector<8x128xf32>
    %268 = arith.maximumf %267, %60 : vector<8x128xf32>
    %269 = arith.subf %266, %268 : vector<8x128xf32>
    %cst_172 = arith.constant 0.000000e+00 : f32
    %270 = vector.broadcast %cst_172 : f32 to vector<8x128xf32>
    %271 = arith.maximumf %269, %270 : vector<8x128xf32>
    %272 = arith.mulf %264, %271 : vector<8x128xf32>
    %273 = vector.broadcast %255 : f32 to vector<8x128xf32>
    %274 = arith.addf %273, %64 : vector<8x128xf32>
    %275 = arith.subf %274, %272 : vector<8x128xf32>
    %276 = arith.divf %272, %275 : vector<8x128xf32>
    %c5_173 = arith.constant 5 : index
    %c0_174 = arith.constant 0 : index
    %c0_175 = arith.constant 0 : index
    %277 = vector.load %arg8[%c5_173, %c0_174, %c0_175] : memref<8x8x128xf32, #tpu.memory_space<vmem>>, vector<1x8x128xf32>
    %278 = vector.shape_cast %277 : vector<1x8x128xf32> to vector<8x128xf32>
    %279 = vector.shape_cast %276 : vector<8x128xf32> to vector<1x8x128xf32>
    tpu.vector_store %arg8[%c5_173, %c0_174, %c0_175], %279 {strides = array<i32>} : memref<8x8x128xf32, #tpu.memory_space<vmem>>, vector<1x8x128xf32>,
    %cst_176 = arith.constant 5.000000e-01 : f32
    %280 = arith.cmpf ogt, %257, %cst_176 : f32
    %281 = vector.broadcast %256 : f32 to vector<8x128xf32>
    %282 = arith.cmpf oeq, %281, %35 : vector<8x128xf32>
    %283 = vector.broadcast %280 : i1 to vector<8x128xi1>
    %284 = arith.andi %283, %282 : vector<8x128xi1>
    %cst_177 = arith.constant 0.000000e+00 : f32
    %285 = vector.broadcast %cst_177 : f32 to vector<8x128xf32>
    %286 = arith.select %284, %276, %285 : vector<8x128xi1>, vector<8x128xf32>
    %287 = arith.maximumf %250, %286 : vector<8x128xf32>
    %c6_178 = arith.constant 6 : index
    %c0_179 = arith.constant 0 : index
    %288 = memref.load %arg1[%c6_178, %c0_179] : memref<8x8xf32, #tpu.memory_space<smem>>
    %c6_180 = arith.constant 6 : index
    %c1_181 = arith.constant 1 : index
    %289 = memref.load %arg1[%c6_180, %c1_181] : memref<8x8xf32, #tpu.memory_space<smem>>
    %c6_182 = arith.constant 6 : index
    %c2_183 = arith.constant 2 : index
    %290 = memref.load %arg1[%c6_182, %c2_183] : memref<8x8xf32, #tpu.memory_space<smem>>
    %c6_184 = arith.constant 6 : index
    %c3_185 = arith.constant 3 : index
    %291 = memref.load %arg1[%c6_184, %c3_185] : memref<8x8xf32, #tpu.memory_space<smem>>
    %c6_186 = arith.constant 6 : index
    %c4_187 = arith.constant 4 : index
    %292 = memref.load %arg1[%c6_186, %c4_187] : memref<8x8xf32, #tpu.memory_space<smem>>
    %c6_188 = arith.constant 6 : index
    %c5_189 = arith.constant 5 : index
    %293 = memref.load %arg1[%c6_188, %c5_189] : memref<8x8xf32, #tpu.memory_space<smem>>
    %c6_190 = arith.constant 6 : index
    %c6_191 = arith.constant 6 : index
    %294 = memref.load %arg1[%c6_190, %c6_191] : memref<8x8xf32, #tpu.memory_space<smem>>
    %295 = vector.broadcast %290 : f32 to vector<8x128xf32>
    %296 = arith.minimumf %295, %57 : vector<8x128xf32>
    %297 = vector.broadcast %288 : f32 to vector<8x128xf32>
    %298 = arith.maximumf %297, %54 : vector<8x128xf32>
    %299 = arith.subf %296, %298 : vector<8x128xf32>
    %cst_192 = arith.constant 0.000000e+00 : f32
    %300 = vector.broadcast %cst_192 : f32 to vector<8x128xf32>
    %301 = arith.maximumf %299, %300 : vector<8x128xf32>
    %302 = vector.broadcast %291 : f32 to vector<8x128xf32>
    %303 = arith.minimumf %302, %63 : vector<8x128xf32>
    %304 = vector.broadcast %289 : f32 to vector<8x128xf32>
    %305 = arith.maximumf %304, %60 : vector<8x128xf32>
    %306 = arith.subf %303, %305 : vector<8x128xf32>
    %cst_193 = arith.constant 0.000000e+00 : f32
    %307 = vector.broadcast %cst_193 : f32 to vector<8x128xf32>
    %308 = arith.maximumf %306, %307 : vector<8x128xf32>
    %309 = arith.mulf %301, %308 : vector<8x128xf32>
    %310 = vector.broadcast %292 : f32 to vector<8x128xf32>
    %311 = arith.addf %310, %64 : vector<8x128xf32>
    %312 = arith.subf %311, %309 : vector<8x128xf32>
    %313 = arith.divf %309, %312 : vector<8x128xf32>
    %c6_194 = arith.constant 6 : index
    %c0_195 = arith.constant 0 : index
    %c0_196 = arith.constant 0 : index
    %314 = vector.load %arg8[%c6_194, %c0_195, %c0_196] : memref<8x8x128xf32, #tpu.memory_space<vmem>>, vector<1x8x128xf32>
    %315 = vector.shape_cast %314 : vector<1x8x128xf32> to vector<8x128xf32>
    %316 = vector.shape_cast %313 : vector<8x128xf32> to vector<1x8x128xf32>
    tpu.vector_store %arg8[%c6_194, %c0_195, %c0_196], %316 {strides = array<i32>} : memref<8x8x128xf32, #tpu.memory_space<vmem>>, vector<1x8x128xf32>,
    %cst_197 = arith.constant 5.000000e-01 : f32
    %317 = arith.cmpf ogt, %294, %cst_197 : f32
    %318 = vector.broadcast %293 : f32 to vector<8x128xf32>
    %319 = arith.cmpf oeq, %318, %35 : vector<8x128xf32>
    %320 = vector.broadcast %317 : i1 to vector<8x128xi1>
    %321 = arith.andi %320, %319 : vector<8x128xi1>
    %cst_198 = arith.constant 0.000000e+00 : f32
    %322 = vector.broadcast %cst_198 : f32 to vector<8x128xf32>
    %323 = arith.select %321, %313, %322 : vector<8x128xi1>, vector<8x128xf32>
    %324 = arith.maximumf %287, %323 : vector<8x128xf32>
    %c7_199 = arith.constant 7 : index
    %c0_200 = arith.constant 0 : index
    %325 = memref.load %arg1[%c7_199, %c0_200] : memref<8x8xf32, #tpu.memory_space<smem>>
    %c7_201 = arith.constant 7 : index
    %c1_202 = arith.constant 1 : index
    %326 = memref.load %arg1[%c7_201, %c1_202] : memref<8x8xf32, #tpu.memory_space<smem>>
    %c7_203 = arith.constant 7 : index
    %c2_204 = arith.constant 2 : index
    %327 = memref.load %arg1[%c7_203, %c2_204] : memref<8x8xf32, #tpu.memory_space<smem>>
    %c7_205 = arith.constant 7 : index
    %c3_206 = arith.constant 3 : index
    %328 = memref.load %arg1[%c7_205, %c3_206] : memref<8x8xf32, #tpu.memory_space<smem>>
    %c7_207 = arith.constant 7 : index
    %c4_208 = arith.constant 4 : index
    %329 = memref.load %arg1[%c7_207, %c4_208] : memref<8x8xf32, #tpu.memory_space<smem>>
    %c7_209 = arith.constant 7 : index
    %c5_210 = arith.constant 5 : index
    %330 = memref.load %arg1[%c7_209, %c5_210] : memref<8x8xf32, #tpu.memory_space<smem>>
    %c7_211 = arith.constant 7 : index
    %c6_212 = arith.constant 6 : index
    %331 = memref.load %arg1[%c7_211, %c6_212] : memref<8x8xf32, #tpu.memory_space<smem>>
    %332 = vector.broadcast %327 : f32 to vector<8x128xf32>
    %333 = arith.minimumf %332, %57 : vector<8x128xf32>
    %334 = vector.broadcast %325 : f32 to vector<8x128xf32>
    %335 = arith.maximumf %334, %54 : vector<8x128xf32>
    %336 = arith.subf %333, %335 : vector<8x128xf32>
    %cst_213 = arith.constant 0.000000e+00 : f32
    %337 = vector.broadcast %cst_213 : f32 to vector<8x128xf32>
    %338 = arith.maximumf %336, %337 : vector<8x128xf32>
    %339 = vector.broadcast %328 : f32 to vector<8x128xf32>
    %340 = arith.minimumf %339, %63 : vector<8x128xf32>
    %341 = vector.broadcast %326 : f32 to vector<8x128xf32>
    %342 = arith.maximumf %341, %60 : vector<8x128xf32>
    %343 = arith.subf %340, %342 : vector<8x128xf32>
    %cst_214 = arith.constant 0.000000e+00 : f32
    %344 = vector.broadcast %cst_214 : f32 to vector<8x128xf32>
    %345 = arith.maximumf %343, %344 : vector<8x128xf32>
    %346 = arith.mulf %338, %345 : vector<8x128xf32>
    %347 = vector.broadcast %329 : f32 to vector<8x128xf32>
    %348 = arith.addf %347, %64 : vector<8x128xf32>
    %349 = arith.subf %348, %346 : vector<8x128xf32>
    %350 = arith.divf %346, %349 : vector<8x128xf32>
    %c7_215 = arith.constant 7 : index
    %c0_216 = arith.constant 0 : index
    %c0_217 = arith.constant 0 : index
    %351 = vector.load %arg8[%c7_215, %c0_216, %c0_217] : memref<8x8x128xf32, #tpu.memory_space<vmem>>, vector<1x8x128xf32>
    %352 = vector.shape_cast %351 : vector<1x8x128xf32> to vector<8x128xf32>
    %353 = vector.shape_cast %350 : vector<8x128xf32> to vector<1x8x128xf32>
    tpu.vector_store %arg8[%c7_215, %c0_216, %c0_217], %353 {strides = array<i32>} : memref<8x8x128xf32, #tpu.memory_space<vmem>>, vector<1x8x128xf32>,
    %cst_218 = arith.constant 5.000000e-01 : f32
    %354 = arith.cmpf ogt, %331, %cst_218 : f32
    %355 = vector.broadcast %330 : f32 to vector<8x128xf32>
    %356 = arith.cmpf oeq, %355, %35 : vector<8x128xf32>
    %357 = vector.broadcast %354 : i1 to vector<8x128xi1>
    %358 = arith.andi %357, %356 : vector<8x128xi1>
    %cst_219 = arith.constant 0.000000e+00 : f32
    %359 = vector.broadcast %cst_219 : f32 to vector<8x128xf32>
    %360 = arith.select %358, %350, %359 : vector<8x128xi1>, vector<8x128xf32>
    %361 = arith.maximumf %324, %360 : vector<8x128xf32>
    %cst_220 = arith.constant 5.000000e-01 : f32
    %362 = vector.broadcast %cst_220 : f32 to vector<8x128xf32>
    %363 = arith.cmpf ole, %361, %362 : vector<8x128xf32>
    %364 = arith.extui %363 : vector<8x128xi1> to vector<8x128xi32>
    %365 = arith.sitofp %364 : vector<8x128xi32> to vector<8x128xf32>
    %366 = arith.mulf %13, %365 : vector<8x128xf32>
    %367 = arith.mulf %23, %25 : vector<8x128xf32>
    %cst_221 = arith.constant 2.000000e+00 : f32
    %368 = vector.broadcast %cst_221 : f32 to vector<8x128xf32>
    %369 = arith.subf %368, %367 : vector<8x128xf32>
    %370 = arith.mulf %369, %11 : vector<8x128xf32>
    %cst_222 = arith.constant 0.000000e+00 : f32
    %371 = vector.broadcast %cst_222 : f32 to vector<8x128xf32>
    %372 = arith.maximumf %1, %371 : vector<8x128xf32>
    %373 = arith.mulf %1, %15 : vector<8x128xf32>
    %374 = arith.subf %372, %373 : vector<8x128xf32>
    %375 = math.absf %1 : vector<8x128xf32>
    %cst_223 = arith.constant 0.000000e+00 : f32
    %376 = vector.broadcast %cst_223 : f32 to vector<8x128xf32>
    %377 = arith.subf %376, %375 : vector<8x128xf32>
    %378 = math.exp %377 : vector<8x128xf32>
    %cst_224 = arith.constant 1.000000e+00 : f32
    %379 = vector.broadcast %cst_224 : f32 to vector<8x128xf32>
    %380 = arith.addf %379, %378 : vector<8x128xf32>
    %381 = math.log %380 : vector<8x128xf32>
    %382 = arith.addf %374, %381 : vector<8x128xf32>
    %383 = arith.mulf %382, %370 : vector<8x128xf32>
    %384 = vector.shape_cast %383 : vector<8x128xf32> to vector<1x8x128xf32>
    %cst_225 = arith.constant dense<0.000000e+00> : vector<1xf32>
    %385 = vector.multi_reduction <add>, %384, %cst_225 [1, 2] : vector<1x8x128xf32> to vector<1xf32>
    %386 = vector.shape_cast %385 : vector<1xf32> to vector<1x1x1xf32>
    %387 = vector.extract %386[0, 0, 0] : f32 from vector<1x1x1xf32>
    %cst_226 = arith.constant 0.000000e+00 : f32
    %388 = vector.broadcast %cst_226 : f32 to vector<8x128xf32>
    %389 = arith.maximumf %3, %388 : vector<8x128xf32>
    %390 = arith.mulf %3, %17 : vector<8x128xf32>
    %391 = arith.subf %389, %390 : vector<8x128xf32>
    %392 = math.absf %3 : vector<8x128xf32>
    %cst_227 = arith.constant 0.000000e+00 : f32
    %393 = vector.broadcast %cst_227 : f32 to vector<8x128xf32>
    %394 = arith.subf %393, %392 : vector<8x128xf32>
    %395 = math.exp %394 : vector<8x128xf32>
    %cst_228 = arith.constant 1.000000e+00 : f32
    %396 = vector.broadcast %cst_228 : f32 to vector<8x128xf32>
    %397 = arith.addf %396, %395 : vector<8x128xf32>
    %398 = math.log %397 : vector<8x128xf32>
    %399 = arith.addf %391, %398 : vector<8x128xf32>
    %400 = arith.mulf %399, %370 : vector<8x128xf32>
    %401 = vector.shape_cast %400 : vector<8x128xf32> to vector<1x8x128xf32>
    %cst_229 = arith.constant dense<0.000000e+00> : vector<1xf32>
    %402 = vector.multi_reduction <add>, %401, %cst_229 [1, 2] : vector<1x8x128xf32> to vector<1xf32>
    %403 = vector.shape_cast %402 : vector<1xf32> to vector<1x1x1xf32>
    %404 = vector.extract %403[0, 0, 0] : f32 from vector<1x1x1xf32>
    %405 = arith.subf %5, %19 : vector<8x128xf32>
    %406 = arith.mulf %405, %405 : vector<8x128xf32>
    %407 = arith.mulf %406, %370 : vector<8x128xf32>
    %408 = vector.shape_cast %407 : vector<8x128xf32> to vector<1x8x128xf32>
    %cst_230 = arith.constant dense<0.000000e+00> : vector<1xf32>
    %409 = vector.multi_reduction <add>, %408, %cst_230 [1, 2] : vector<1x8x128xf32> to vector<1xf32>
    %410 = vector.shape_cast %409 : vector<1xf32> to vector<1x1x1xf32>
    %411 = vector.extract %410[0, 0, 0] : f32 from vector<1x1x1xf32>
    %412 = arith.subf %7, %21 : vector<8x128xf32>
    %413 = arith.mulf %412, %412 : vector<8x128xf32>
    %414 = arith.mulf %413, %370 : vector<8x128xf32>
    %415 = vector.shape_cast %414 : vector<8x128xf32> to vector<1x8x128xf32>
    %cst_231 = arith.constant dense<0.000000e+00> : vector<1xf32>
    %416 = vector.multi_reduction <add>, %415, %cst_231 [1, 2] : vector<1x8x128xf32> to vector<1xf32>
    %417 = vector.shape_cast %416 : vector<1xf32> to vector<1x1x1xf32>
    %418 = vector.extract %417[0, 0, 0] : f32 from vector<1x1x1xf32>
    %cst_232 = arith.constant 0.000000e+00 : f32
    %419 = vector.broadcast %cst_232 : f32 to vector<8x128xf32>
    %420 = arith.maximumf %9, %419 : vector<8x128xf32>
    %421 = arith.mulf %9, %11 : vector<8x128xf32>
    %422 = arith.subf %420, %421 : vector<8x128xf32>
    %423 = math.absf %9 : vector<8x128xf32>
    %cst_233 = arith.constant 0.000000e+00 : f32
    %424 = vector.broadcast %cst_233 : f32 to vector<8x128xf32>
    %425 = arith.subf %424, %423 : vector<8x128xf32>
    %426 = math.exp %425 : vector<8x128xf32>
    %cst_234 = arith.constant 1.000000e+00 : f32
    %427 = vector.broadcast %cst_234 : f32 to vector<8x128xf32>
    %428 = arith.addf %427, %426 : vector<8x128xf32>
    %429 = math.log %428 : vector<8x128xf32>
    %430 = arith.addf %422, %429 : vector<8x128xf32>
    %431 = arith.addf %11, %366 : vector<8x128xf32>
    %432 = arith.mulf %430, %431 : vector<8x128xf32>
    %433 = vector.shape_cast %432 : vector<8x128xf32> to vector<1x8x128xf32>
    %cst_235 = arith.constant dense<0.000000e+00> : vector<1xf32>
    %434 = vector.multi_reduction <add>, %433, %cst_235 [1, 2] : vector<1x8x128xf32> to vector<1xf32>
    %435 = vector.shape_cast %434 : vector<1xf32> to vector<1x1x1xf32>
    %436 = vector.extract %435[0, 0, 0] : f32 from vector<1x1x1xf32>
    %c0_236 = arith.constant 0 : index
    %c0_237 = arith.constant 0 : index
    %c0_238 = arith.constant 0 : index
    %437 = vector.load %arg3[%c0_236, %c0_237, %c0_238] : memref<4x8x128xf32, #tpu.memory_space<vmem>>, vector<4x8x128xf32>
    %c0_239 = arith.constant 0 : index
    %c0_240 = arith.constant 0 : index
    %c0_241 = arith.constant 0 : index
    %438 = vector.load %arg5[%c0_239, %c0_240, %c0_241] : memref<4x8x128xf32, #tpu.memory_space<vmem>>, vector<4x8x128xf32>
    %cst_242 = arith.constant 0.000000e+00 : f32
    %439 = vector.broadcast %cst_242 : f32 to vector<4x8x128xf32>
    %440 = arith.maximumf %437, %439 : vector<4x8x128xf32>
    %441 = arith.mulf %437, %438 : vector<4x8x128xf32>
    %442 = arith.subf %440, %441 : vector<4x8x128xf32>
    %443 = math.absf %437 : vector<4x8x128xf32>
    %cst_243 = arith.constant 0.000000e+00 : f32
    %444 = vector.broadcast %cst_243 : f32 to vector<4x8x128xf32>
    %445 = arith.subf %444, %443 : vector<4x8x128xf32>
    %446 = math.exp %445 : vector<4x8x128xf32>
    %cst_244 = arith.constant 1.000000e+00 : f32
    %447 = vector.broadcast %cst_244 : f32 to vector<4x8x128xf32>
    %448 = arith.addf %447, %446 : vector<4x8x128xf32>
    %449 = math.log %448 : vector<4x8x128xf32>
    %450 = arith.addf %442, %449 : vector<4x8x128xf32>
    %451 = vector.shape_cast %11 : vector<8x128xf32> to vector<1x8x128xf32>
    %452 = vector.broadcast %451 : vector<1x8x128xf32> to vector<4x8x128xf32>
    %453 = arith.mulf %450, %452 : vector<4x8x128xf32>
    %454 = vector.shape_cast %453 : vector<4x8x128xf32> to vector<1x4x8x128xf32>
    %cst_245 = arith.constant dense<0.000000e+00> : vector<1xf32>
    %455 = vector.multi_reduction <add>, %454, %cst_245 [1, 2, 3] : vector<1x4x8x128xf32> to vector<1xf32>
    %456 = vector.shape_cast %455 : vector<1xf32> to vector<1x1x1x1xf32>
    %457 = vector.extract %456[0, 0, 0, 0] : f32 from vector<1x1x1x1xf32>
    %cst_246 = arith.constant 5.000000e-01 : f32
    %458 = arith.mulf %387, %cst_246 : f32
    %cst_247 = arith.constant 5.000000e-01 : f32
    %459 = arith.mulf %404, %cst_247 : f32
    %cst_248 = arith.constant 2.500000e-01 : f32
    %460 = arith.mulf %411, %cst_248 : f32
    %cst_249 = arith.constant 2.500000e-01 : f32
    %461 = arith.mulf %418, %cst_249 : f32
    %cst_250 = arith.constant 5.000000e-01 : f32
    %462 = arith.mulf %436, %cst_250 : f32
    %cst_251 = arith.constant 5.000000e-01 : f32
    %463 = arith.mulf %457, %cst_251 : f32
    %464 = arith.addf %458, %459 : f32
    %465 = arith.addf %464, %460 : f32
    %466 = arith.addf %465, %461 : f32
    %467 = arith.addf %466, %462 : f32
    %468 = arith.addf %467, %463 : f32
    %cst_252 = arith.constant 1.000000e+00 : f32
    %469 = vector.broadcast %cst_252 : f32 to vector<1x128xf32>
    %470 = vector.broadcast %468 : f32 to vector<1x128xf32>
    %471 = arith.mulf %470, %469 : vector<1x128xf32>
    %c0_253 = arith.constant 0 : index
    %c0_254 = arith.constant 0 : index
    %472 = vector.load %arg7[%c0_253, %c0_254] : memref<8x128xf32, #tpu.memory_space<vmem>>, vector<1x128xf32>
    tpu.vector_store %arg7[%c0_253, %c0_254], %471 {strides = array<i32>} : memref<8x128xf32, #tpu.memory_space<vmem>>, vector<1x128xf32>,
    %473 = vector.broadcast %458 : f32 to vector<1x128xf32>
    %474 = arith.mulf %473, %469 : vector<1x128xf32>
    %c1_255 = arith.constant 1 : index
    %c0_256 = arith.constant 0 : index
    %475 = vector.load %arg7[%c1_255, %c0_256] : memref<8x128xf32, #tpu.memory_space<vmem>>, vector<1x128xf32>
    tpu.vector_store %arg7[%c1_255, %c0_256], %474 {strides = array<i32>} : memref<8x128xf32, #tpu.memory_space<vmem>>, vector<1x128xf32>,
    %476 = vector.broadcast %459 : f32 to vector<1x128xf32>
    %477 = arith.mulf %476, %469 : vector<1x128xf32>
    %c2_257 = arith.constant 2 : index
    %c0_258 = arith.constant 0 : index
    %478 = vector.load %arg7[%c2_257, %c0_258] : memref<8x128xf32, #tpu.memory_space<vmem>>, vector<1x128xf32>
    tpu.vector_store %arg7[%c2_257, %c0_258], %477 {strides = array<i32>} : memref<8x128xf32, #tpu.memory_space<vmem>>, vector<1x128xf32>,
    %479 = vector.broadcast %460 : f32 to vector<1x128xf32>
    %480 = arith.mulf %479, %469 : vector<1x128xf32>
    %c3_259 = arith.constant 3 : index
    %c0_260 = arith.constant 0 : index
    %481 = vector.load %arg7[%c3_259, %c0_260] : memref<8x128xf32, #tpu.memory_space<vmem>>, vector<1x128xf32>
    tpu.vector_store %arg7[%c3_259, %c0_260], %480 {strides = array<i32>} : memref<8x128xf32, #tpu.memory_space<vmem>>, vector<1x128xf32>,
    %482 = vector.broadcast %461 : f32 to vector<1x128xf32>
    %483 = arith.mulf %482, %469 : vector<1x128xf32>
    %c4_261 = arith.constant 4 : index
    %c0_262 = arith.constant 0 : index
    %484 = vector.load %arg7[%c4_261, %c0_262] : memref<8x128xf32, #tpu.memory_space<vmem>>, vector<1x128xf32>
    tpu.vector_store %arg7[%c4_261, %c0_262], %483 {strides = array<i32>} : memref<8x128xf32, #tpu.memory_space<vmem>>, vector<1x128xf32>,
    %485 = vector.broadcast %462 : f32 to vector<1x128xf32>
    %486 = arith.mulf %485, %469 : vector<1x128xf32>
    %c5_263 = arith.constant 5 : index
    %c0_264 = arith.constant 0 : index
    %487 = vector.load %arg7[%c5_263, %c0_264] : memref<8x128xf32, #tpu.memory_space<vmem>>, vector<1x128xf32>
    tpu.vector_store %arg7[%c5_263, %c0_264], %486 {strides = array<i32>} : memref<8x128xf32, #tpu.memory_space<vmem>>, vector<1x128xf32>,
    %488 = vector.broadcast %463 : f32 to vector<1x128xf32>
    %489 = arith.mulf %488, %469 : vector<1x128xf32>
    %c6_265 = arith.constant 6 : index
    %c0_266 = arith.constant 0 : index
    %490 = vector.load %arg7[%c6_265, %c0_266] : memref<8x128xf32, #tpu.memory_space<vmem>>, vector<1x128xf32>
    tpu.vector_store %arg7[%c6_265, %c0_266], %489 {strides = array<i32>} : memref<8x128xf32, #tpu.memory_space<vmem>>, vector<1x128xf32>,
    %cst_267 = arith.constant 0.000000e+00 : f32
    %491 = vector.broadcast %cst_267 : f32 to vector<1x128xf32>
    %c7_268 = arith.constant 7 : index
    %c0_269 = arith.constant 0 : index
    %492 = vector.load %arg7[%c7_268, %c0_269] : memref<8x128xf32, #tpu.memory_space<vmem>>, vector<1x128xf32>
    tpu.vector_store %arg7[%c7_268, %c0_269], %491 {strides = array<i32>} : memref<8x128xf32, #tpu.memory_space<vmem>>, vector<1x128xf32>,
    return
  }
  func.func @transform_0(%arg0: i32) -> (i32, i32) {
    %c0_i32 = arith.constant 0 : i32
    %c0_i32_0 = arith.constant 0 : i32
    %c0_i32_1 = arith.constant 0 : i32
    return %c0_i32, %c0_i32_0 : i32, i32
  }
  func.func @transform_1(%arg0: i32) -> (i32, i32, i32) {
    %c0_i32 = arith.constant 0 : i32
    %c0_i32_0 = arith.constant 0 : i32
    %c0_i32_1 = arith.constant 0 : i32
    return %c0_i32, %arg0, %c0_i32_0 : i32, i32, i32
  }
  func.func @transform_2(%arg0: i32) -> (i32, i32, i32) {
    %c0_i32 = arith.constant 0 : i32
    %c0_i32_0 = arith.constant 0 : i32
    %c0_i32_1 = arith.constant 0 : i32
    return %c0_i32, %arg0, %c0_i32_0 : i32, i32, i32
  }
  func.func @transform_3(%arg0: i32) -> (i32, i32, i32) {
    %c0_i32 = arith.constant 0 : i32
    %c0_i32_0 = arith.constant 0 : i32
    %c0_i32_1 = arith.constant 0 : i32
    return %c0_i32, %arg0, %c0_i32_0 : i32, i32, i32
  }
  func.func @transform_4(%arg0: i32) -> (i32, i32, i32) {
    %c0_i32 = arith.constant 0 : i32
    %c0_i32_0 = arith.constant 0 : i32
    %c0_i32_1 = arith.constant 0 : i32
    return %c0_i32, %arg0, %c0_i32_0 : i32, i32, i32
  }
  func.func @transform_5(%arg0: i32) -> (i32, i32, i32) {
    %c0_i32 = arith.constant 0 : i32
    %c0_i32_0 = arith.constant 0 : i32
    %c0_i32_1 = arith.constant 0 : i32
    return %c0_i32, %arg0, %c0_i32_0 : i32, i32, i32
  }
  func.func @transform_6(%arg0: i32) -> (i32, i32) {
    %c0_i32 = arith.constant 0 : i32
    %c0_i32_0 = arith.constant 0 : i32
    return %c0_i32, %arg0 : i32, i32
  }
  func.func @transform_7(%arg0: i32) -> (i32, i32, i32) {
    %c0_i32 = arith.constant 0 : i32
    %c0_i32_0 = arith.constant 0 : i32
    %c0_i32_1 = arith.constant 0 : i32
    return %c0_i32, %arg0, %c0_i32_0 : i32, i32, i32
  }
}

</mosaic_0001>

<bundles_post_ra>
// kernel: tpu_custom_call.1
= control target key start
LH: loop header
LB: loop body
LE: loop exit
PB: predicated region body
PF: predicated region fallthrough
CT: control target
= control target key end

     0   :  { %s3000_s0 = inlined_call_operand.hbm [shape: f32[8,8], index: 0, kind: input, shape index: {}]   ;;  %s3001_s1 = inlined_call_operand.hbm [shape: f32[5,16,128], index: 1, kind: input, shape index: {}]   ;;  %s3002_s2 = inlined_call_operand.hbm [shape: f32[4,16,128], index: 2, kind: input, shape index: {}]   ;;  %s3003_s3 = inlined_call_operand.hbm [shape: f32[8,16,128], index: 3, kind: input, shape index: {}]   ;;  %s3004_s4 = inlined_call_operand.hbm [shape: f32[4,16,128], index: 4, kind: input, shape index: {}]   ;;  %s3005_s5 = inlined_call_operand.hbm [shape: f32[5,16,128], index: 5, kind: input, shape index: {}]   ;;  %s3006_s6 = inlined_call_operand.hbm [shape: f32[8,256], index: 6, kind: output, shape index: {0}]   ;;  %s3007_s7 = inlined_call_operand.hbm [shape: f32[8,16,128], index: 7, kind: output, shape index: {1}]  }
   0x1   :  { %3026 = sst [smem:[#allocation28_spill]] %s3000_s0 }
   0x2   :  { %3027 = sst [smem:[#allocation29_spill]] %s3002_s2 }
   0x3   :  { %3028 = sst [smem:[#allocation30_spill]] %s3004_s4 }
   0x4   :  { %3029 = sst [smem:[#allocation31_spill]] %s3006_s6 }
   0x5   :  { %3030 = sst [smem:[#allocation32_spill]] %s3007_s7 }
   0x6   :  { %13 = vsyncpa [#allocation5], 0 }
   0x7   :  { %14 = vsyncpa [#allocation3], 0 }
   0x8   :  { %16 = vsyncpa [#allocation3 + $0x1], 0 }
   0x9   :  { %17 = vsyncpa [#allocation8], 0 }
   0xa   :  { %19 = vsyncpa [#allocation8 + $0x1], 0 }
   0xb   :  { %20 = vsyncpa [#allocation11], 0 }
   0xc   :  { %22 = vsyncpa [#allocation11 + $0x1], 0 }
   0xd   :  { %23 = vsyncpa [#allocation4], 0 }
   0xe   :  { %25 = vsyncpa [#allocation4 + $0x1], 0 }
   0xf   :  { %26 = vsyncpa [#allocation15], 0 }
  0x10   :  { %28 = vsyncpa [#allocation15 + $0x1], 0  ;;  %s1976_s24 = smov 0   ;;  %s1978_s25 = smov 0  }
  0x11   :  { %s1980_s26 = smov 0   ;;  %s1982_s27 = smov 0  }
  0x12 LB: > { %3031 = sst [smem:[#allocation22_spill]] %s1914_s24  ;;  %s1997_s28 = sadd.s32 1, %s1926_s27   ;;  %s1926_s27 = sphi %s1982_s27, %s3122_s27   ;;  %s1922_s26 = sphi %s1980_s26, %s3124_s26   ;;  %s1918_s25 = sphi %s1978_s25, %s3126_s25   ;;  %s1914_s24 = sphi %s1976_s24, %s3125_s24  }
  0x13   : > { %3032 = sst [smem:[#allocation23_spill]] %s1922_s26  ;;  %s62_s29 = sadd.s32 1, %s1922_s26 }
  0x14   : > { %3033 = sst [smem:[#allocation24_spill]] %s1926_s27  ;;  %s59_s30 = ssub.s32 %s1926_s27, %s1997_s28 }
  0x15   : > { %3034 = sst [smem:[#allocation25_spill]] %s1997_s28  ;;  %p69_p0 = scmp.ne.s32.totalorder %s1922_s26, %s1918_s25 }
  0x16   : > { %p60_p1 = scmp.eq.s32.totalorder %s59_s30, 0  ;;  %p70_p2 = scmp.eq.s32.totalorder %s1926_s27, 0 }
  0x17   : > { %p1551_p4 = scmp.lt.s32.totalorder %s1926_s27, 2  ;;  %s2014_s9 = sand.u32 1, %s1922_s26  }
  0x18   : > { %s2008_s8 = scalar_select %p60_p1, %s1922_s26, %s62_s29  }
  0x19   : > { %p71_p5 = por %p70_p2, %p69_p0  ;;  %s2017_s10 = sshll.u32 %s1926_s27, 3 }
  0x1a   : > { %3035 = sst [smem:[#allocation26_spill]] %s2008_s8  ;;  %s3008_s12 = sand.u32 1, %s1926_s27  }
  0x1b   : > { %p2019_p6 = pnand %p1551_p4, %p71_p5  ;;  %s3009_s13 = sshll.u32 %s2014_s9, 5 }
  0x1c   : > { %s3037_s2 = sld [smem:[#allocation29_spill]]  ;;  %s290_s18 = scalar_lea.vmem [#allocation7], %s3009_s13 }
  0x1d   : > { %s297_s19 = sshll.u32 %s290_s18, 4  ;;  %s2033_s20 = scalar_lea.sflag [#allocation8], %s3008_s12  ;;  %s298_s19 = int_to_ptr.vmem [resolvable:$true] %s297_s19 }
  0x1e   : > { %p2037_p8 = pneg %p2019_p6 }
  0x22   : > { %s294_s16 = scalar_lea.hbm %s3037_s2, %s2017_s10  ;;  %s1658_s14 = scalar_lea.hbm %s3037_s2, 64 }
  0x23   : > { %s295_s17 = sshll.u32 %s294_s16, 4  ;;  %s296_s17 = int_to_ptr.hbm [resolvable:$true] %s295_s17 }
  0x24   : > { %s1651_s21 = sshra.s32 %s296_s17, 4  ;;  %s1652_s21 = int_to_ptr.hbm [resolvable:$true] %s1651_s21 }
  0x25   : > { %s1653_s22 = scalar_lea.hbm %s1652_s21, 32  ;;  %p1659_p11 = scmp.lt.s32.totalorder %s1652_s21, %s3037_s2 }
  0x26   : > { %p1654_p7 = scmp.ne.s32.totalorder %s1652_s21, %s1653_s22  ;;  %p1660_p12 = scmp.lt.s32.totalorder %s1658_s14, %s1653_s22 }
  0x28   : > { %p1656_p9 = pnand %p2037_p8, %p1654_p7  ;;  %p1661_p13 = por %p1660_p12, %p1659_p11 }
  0x2a   : > { %p1657_p10 = pneg %p1656_p9 }
  0x2c   : > { %p1662_p1 = pnand %p1661_p13, %p1657_p10 }
  0x2e   : > { %1665 = shalt.err (!%p1662_p1)
}
  0x2f   : > { %s3013_s18 = smov 256   ;;  %s3015_s12 = smov 128  }
  0x30   : > { %s3017_s13 = smov 8   ;;  %s3039_s4 = sld [smem:[#allocation30_spill]] }
  0x31   : > { %1533 = dma.hbm_to_vmem [thread:$0]  (!%p2019_p6), %s296_s17, 512, %s298_s19, %s2033_s20, %s3013_s18, %s3015_s12, %s3017_s13  }
  0x32   : > { %s3040_s14 = sshll.u32 %s2014_s9, 5  ;;  %s3041_s2 = sand.u32 1, %s1926_s27  }
  0x33   : > { %s332_s15 = scalar_lea.vmem [#allocation10], %s3040_s14  ;;  %s2063_s8 = scalar_lea.sflag [#allocation11], %s3041_s2 }
  0x34   : > { %s339_s16 = sshll.u32 %s332_s15, 4  ;;  %s340_s16 = int_to_ptr.vmem [resolvable:$true] %s339_s16 }
  0x36   : > { %s336_s22 = scalar_lea.hbm %s3039_s4, %s2017_s10  ;;  %s1688_s29 = scalar_lea.hbm %s3039_s4, 64 }
  0x37   : > { %s337_s30 = sshll.u32 %s336_s22, 4  ;;  %s338_s30 = int_to_ptr.hbm [resolvable:$true] %s337_s30 }
  0x38   : > { %s1681_s28 = sshra.s32 %s338_s30, 4  ;;  %s1682_s28 = int_to_ptr.hbm [resolvable:$true] %s1681_s28 }
  0x39   : > { %s1683_s6 = scalar_lea.hbm %s1682_s28, 32  ;;  %p1689_p7 = scmp.lt.s32.totalorder %s1682_s28, %s3039_s4 }
  0x3a   : > { %p1684_p2 = scmp.ne.s32.totalorder %s1682_s28, %s1683_s6  ;;  %p1690_p9 = scmp.lt.s32.totalorder %s1688_s29, %s1683_s6 }
  0x3c   : > { %p1686_p4 = pnand %p1684_p2, %p2037_p8  ;;  %p1691_p10 = por %p1690_p9, %p1689_p7 }
  0x3e   : > { %p1687_p5 = pneg %p1686_p4 }
  0x40   : > { %p1692_p11 = pnand %p1691_p10, %p1687_p5 }
  0x42   : > { %1695 = shalt.err (!%p1692_p11)
}
  0x43   : > { %1539 = dma.hbm_to_vmem [thread:$0]  (!%p2019_p6), %s338_s30, 512, %s340_s16, %s2063_s8, %s3013_s18, %s3015_s12, %s3017_s13  }
  0x44   : > { %s2080_s2 = sadd.s32 4294967295, %s1926_s27   ;;  %s1385_s6 = sadd.s32 4294967294, %s1926_s27  }
  0x45   : > { %p75_p12 = scmp.ne.s32.totalorder %s1918_s25, %s1914_s24  ;;  %p3022_p13 = scmp.eq.s32.totalorder %s2080_s2, 0 }
  0x46   : > { %p203_p1 = scmp.eq.s32.totalorder %s2080_s2, 1  ;;  %p209_p2 = scmp.eq.s32.totalorder %s1385_s6, 1 }
  0x47   : > { %p2089_p4 = por %p3022_p13, %p75_p12  ;;  %p1386_p5 = scmp.ge.s32.totalorder %s1926_s27, 1 }
  0x48   : > { %p2097_p7 = por %p203_p1, %p69_p0  ;;  %p2101_p9 = por %p209_p2, %p75_p12 }
  0x49   : > { %p242_p10 = scmp.lt.s32.totalorder %s1926_s27, 3  ;;  %s3046_s0 = sld [smem:[#allocation28_spill]] }
  0x4a   : > { %s3044_s14 = scalar_select %p2101_p9, 1, 0 }
  0x4b   : > { %p2109_p11 = pnand %p1386_p5, %p242_p10  ;;  %s3023_s29 = smul.u32 40, %s2014_s9 }
  0x4c   : > { %3045 = sst [smem:[#allocation27_spill]] %s3044_s14  ;;  %s273_s6 = scalar_lea.hbm %s3001_s1, %s2017_s10 }
  0x4d   : > { %p1523_p0 = pneg %p2109_p11  ;;  %s274_s18 = sshll.u32 %s273_s6, 4  ;;  %s275_s18 = int_to_ptr.hbm [resolvable:$true] %s274_s18 }
  0x4e   : > { %s269_s15 = scalar_lea.vmem [#allocation6], %s3023_s29  ;;  %s1392_s12 = sshll.u32 %s2014_s9, 6 }
  0x4f   : > { %s254_s17 = sshll.u32 %s3046_s0, 4  ;;  %p1524_p12 = pnand %p1523_p0, %p3022_p13  ;;  %s255_s17 = int_to_ptr.hbm [resolvable:$true] %s254_s17 }
  0x50   : > { %s276_s16 = sshll.u32 %s269_s15, 4  ;;  %s1931_s13 = smov [#allocation2]   ;;  %s277_s16 = int_to_ptr.vmem [resolvable:$true] %s276_s16 }
  0x51   : > { %1526 = dma.hbm_to_smem (!%p1524_p12), %s255_s17, 128, %s1931_s13, [#allocation5]  }
  0x52   : > { %s266_s0 = scalar_lea.sflag [#allocation3], %s2014_s9  ;;  %s1726_s4 = sshra.s32 %s275_s18, 4  ;;  %s1727_s4 = int_to_ptr.hbm [resolvable:$true] %s1726_s4 }
  0x53   : > { %s1728_s26 = scalar_lea.hbm %s1727_s4, 40  ;;  %s1733_s6 = scalar_lea.hbm %s3001_s1, 80 }
  0x54   : > { %p1729_p1 = scmp.ne.s32.totalorder %s1727_s4, %s1728_s26  ;;  %p1734_p10 = scmp.lt.s32.totalorder %s1727_s4, %s3001_s1 }
  0x55   : > { %p1735_p0 = scmp.lt.s32.totalorder %s1733_s6, %s1728_s26 }
  0x56   : > { %p1731_p2 = pnand %p1729_p1, %p2037_p8 }
  0x57   : > { %p1736_p3 = por %p1735_p0, %p1734_p10 }
  0x58   : > { %p1732_p5 = pneg %p1731_p2 }
  0x5a   : > { %p1737_p13 = pnand %p1736_p3, %p1732_p5 }
  0x5c   : > { %1740 = shalt.err (!%p1737_p13)
}
  0x5d   : > { %s3048_s13 = smov 8   ;;  %s3049_s17 = smov 128  }
  0x5e   : > { %s3050_s15 = smov 256   ;;  %s315_s21 = scalar_lea.hbm %s3003_s3, %s2017_s10 }
  0x5f   : > { %1530 = dma.hbm_to_vmem [thread:$0]  (!%p2019_p6), %s275_s18, 640, %s277_s16, %s266_s0, %s3050_s15, %s3049_s17, %s3048_s13  }
  0x60   : > { %s316_s22 = sshll.u32 %s315_s21, 4  ;;  %s311_s7 = scalar_lea.vmem [#allocation9], %s1392_s12  ;;  %s317_s22 = int_to_ptr.hbm [resolvable:$true] %s316_s22 }
  0x61   : > { %s318_s27 = sshll.u32 %s311_s7, 4  ;;  %s1756_s4 = sshra.s32 %s317_s22, 4  ;;  %s319_s27 = int_to_ptr.vmem [resolvable:$true] %s318_s27  ;;  %s1757_s4 = int_to_ptr.hbm [resolvable:$true] %s1756_s4 }
  0x62   : > { %s1758_s26 = scalar_lea.hbm %s1757_s4, 64  ;;  %s1763_s0 = scalar_lea.hbm %s3003_s3, 128 }
  0x63   : > { %p1759_p3 = scmp.ne.s32.totalorder %s1757_s4, %s1758_s26  ;;  %p1764_p1 = scmp.lt.s32.totalorder %s1757_s4, %s3003_s3 }
  0x64   : > { %p1765_p2 = scmp.lt.s32.totalorder %s1763_s0, %s1758_s26 }
  0x65   : > { %p1761_p13 = pnand %p1759_p3, %p2037_p8 }
  0x66   : > { %p1766_p5 = por %p1765_p2, %p1764_p1 }
  0x67   : > { %p1762_p12 = pneg %p1761_p13 }
  0x69   : > { %p1767_p10 = pnand %p1766_p5, %p1762_p12 }
  0x6b   : > { %1770 = shalt.err (!%p1767_p10)
}
  0x6c   : > { %1536 = dma.hbm_to_vmem [thread:$0]  (!%p2019_p6), %s317_s22, 1024, %s319_s27, %s2033_s20, %s3050_s15, %s3049_s17, %s3048_s13  }
  0x6d   : > { %s357_s12 = scalar_lea.hbm %s3005_s5, %s2017_s10  ;;  %s3051_s21 = smul.u32 40, %s2014_s9 }
  0x6e   : > { %s358_s29 = sshll.u32 %s357_s12, 4  ;;  %s1793_s20 = scalar_lea.hbm %s3005_s5, 80  ;;  %s359_s29 = int_to_ptr.hbm [resolvable:$true] %s358_s29 }
  0x6f   : > { %s353_s4 = scalar_lea.vmem [#allocation12], %s3051_s21  ;;  %s1786_s14 = sshra.s32 %s359_s29, 4  ;;  %s1787_s14 = int_to_ptr.hbm [resolvable:$true] %s1786_s14 }
  0x70   : > { %s360_s26 = sshll.u32 %s353_s4, 4  ;;  %s1788_s6 = scalar_lea.hbm %s1787_s14, 40  ;;  %s361_s26 = int_to_ptr.vmem [resolvable:$true] %s360_s26 }
  0x71   : > { %p1789_p0 = scmp.ne.s32.totalorder %s1787_s14, %s1788_s6  ;;  %p1794_p12 = scmp.lt.s32.totalorder %s1787_s14, %s3005_s5 }
  0x72   : > { %p1795_p1 = scmp.lt.s32.totalorder %s1793_s20, %s1788_s6 }
  0x73   : > { %p1791_p3 = pnand %p1789_p0, %p2037_p8 }
  0x74   : > { %p1796_p2 = por %p1795_p1, %p1794_p12 }
  0x75   : > { %p1792_p13 = pneg %p1791_p3 }
  0x77   : > { %p1797_p5 = pnand %p1796_p2, %p1792_p13 }
  0x79   : > { %1800 = shalt.err (!%p1797_p5)
}
  0x7a   : > { %1542 = dma.hbm_to_vmem [thread:$0]  (!%p2019_p6), %s359_s29, 640, %s361_s26, %s2063_s8, %s3050_s15, %s3049_s17, %s3048_s13  }
  0x7b   : > { %372 = sbr.rel (%p2109_p11) target bundleno = 460 (0x1cc), region = 44  ;;  %p3052_p8 = scmp.eq.s32.totalorder (!%p2109_p11), %s2080_s2, 0 }
  0x80   : > { %1889 = dma.done.wait (%p3052_p8), [#allocation5], 128   ;;  %p3053_p10 = pmov %p3052_p8 }
  0x81   : > { %s2184_s9 = sand.u32 1, %s1918_s25  }
  0x82   : > { %1891 = vsyncadd (%p3053_p10), [#allocation5], 4294967168  ;;  %s1492_s10 = smul.u32 40, %s2184_s9  ;;  %s380_s11 = scalar_lea.sflag [#allocation3], %s2184_s9 }
  0x84   : > { %s2188_s23 = scalar_lea.vmem [#allocation6], %s1492_s10 }
  0x85   : > { %1893 = dma.done.wait (%p2089_p4), %s380_s11, 640  }
  0x86   : > { %1895 = vsyncadd (%p2089_p4), %s380_s11, 4294966656  ;;  %s389_s8 = sand.u32 1, %s2080_s2   ;;  %s1399_s19 = sshll.u32 %s2184_s9, 5 }
  0x87   : > { %s390_s13 = scalar_lea.sflag [#allocation8], %s389_s8  ;;  %s2196_s17 = scalar_lea.vmem [#allocation7], %s1399_s19 }
  0x88   : > { %1897 = dma.done.wait (%p2089_p4), %s390_s13, 1536  }
  0x89   : > { %1899 = vsyncadd (%p2089_p4), %s390_s13, 4294965760  ;;  %s1400_s15 = sshll.u32 %s2184_s9, 6  ;;  %s410_s7 = scalar_lea.sflag [#allocation11], %s389_s8 }
  0x8a   : > { %s2205_s16 = scalar_lea.vmem [#allocation9], %s1400_s15  ;;  %s2207_s24 = scalar_lea.vmem [#allocation10], %s1399_s19 }
  0x8b   : > { %1901 = dma.done.wait (%p2089_p4), %s410_s7, 1152  }
  0x8c   : > { %1903 = vsyncadd (%p2089_p4), %s410_s7, 4294966144  ;;  %s2213_s12 = scalar_lea.vmem [#allocation12], %s1492_s10 }
  0x8d   : > { %429 = sfence }
  0x8e   : > { %v2216_v0 = vld [vmem:[%s2188_s23] sm:$0xff]  ;;  %v1405_v6 = vld [vmem:[%s2188_s23 + $0x10] sm:$0xff]  ;;  %v2226_v11 = vld [vmem:[%s2188_s23 + $0x8] sm:$0xff]  ;;  %s2239_s28 = sld [smem:[#allocation2]] }
  0x8f   : > { %v1413_v1 = vld [vmem:[%s2205_s16 + $0x30] sm:$0xff]  ;;  %v1414_v2 = vld [vmem:[%s2205_s16 + $0x38] sm:$0xff]  ;;  %v968_v3 = vand.u32 2147483647, %v2216_v0  ;;  %v1419_v5 = vmul.f32 -1.442695, %v2216_v0 }
  0x90   : > { %v962_v4 = vmul.f32 %v1414_v2, %v1413_v1  ;;  %v1411_v7 = vld [vmem:[%s2205_s16 + $0x20] sm:$0xff]  ;;  %v1420_v13 = vmul.f32 -1.442695, %v2226_v11  ;;  %v1412_v16 = vld [vmem:[%s2205_s16 + $0x28] sm:$0xff]  ;;  %v989_v18 = vand.u32 2147483647, %v2226_v11 }
  0x91   : > { %v490_v8 = vld [vmem:[%s2205_s16] sm:$0xff]  ;;  %v969_v9 = vsub.f32 0.0, %v968_v3  ;;  %v1007_v10 = vsub.f32 %v1405_v6, %v1411_v7  ;;  %1594 = vpow2.f32 %v1419_v5  ;;  %v1406_v19 = vld [vmem:[%s2188_s23 + $0x18] sm:$0xff]  ;;  %v554_v27 = vmul.f32 1.442695, %v1405_v6  ;;  %v1410_v35 = vld [vmem:[%s2205_s16 + $0x18] sm:$0xff] }
  0x92   : > { %v963_v12 = vsub.f32 2.0, %v962_v4  ;;  %1596 = vpow2.f32 %v1420_v13  ;;  %v1019_v20 = vsub.f32 %v1406_v19, %v1412_v16  ;;  %v990_v22 = vsub.f32 0.0, %v989_v18  ;;  %v1409_v30 = vld [vmem:[%s2205_s16 + $0x10] sm:$0xff]  ;;  %s2242_s29 = sld [smem:[#allocation2 + $0x1]]  ;;  %v1417_v59 = vld [vmem:[%s2213_s12 + $0x18] sm:$0xff]  ;;  %v505_v5 = vld [vmem:[%s2213_s12] sm:$0xff] }
  0x93   : > { %v970_v14 = vmul.f32 1.442695, %v969_v9  ;;  %v1008_v15 = vmul.f32 %v1007_v10, %v1007_v10  ;;  %v557_v33 = vmul.f32 1.442695, %v1406_v19  ;;  %v965_v36 = vmax.f32 %v2216_v0, 0.0  ;;  %s2247_s21 = sld [smem:[#allocation2 + $0x2]] }
  0x94   : > { %v2230_v17 = vmul.f32 %v963_v12, %v490_v8  ;;  %v991_v24 = vmul.f32 1.442695, %v990_v22  ;;  %v1020_v25 = vmul.f32 %v1019_v20, %v1019_v20  ;;  %v966_v37 = vmul.f32 %v1409_v30, %v2216_v0  ;;  %s2249_s4 = sld [smem:[#allocation2 + $0x3]]  ;;  %v1416_v47 = vld [vmem:[%s2213_s12 + $0x10] sm:$0xff] }
  0x95   : > { %1598 = vpow2.f32 %v970_v14  ;;  %v986_v40 = vmax.f32 %v2226_v11, 0.0  ;;  %v987_v41 = vmul.f32 %v1410_v35, %v2226_v11  ;;  %s2253_s26 = sld [smem:[#allocation2 + $0x4]]  ;;  %v576_v7 = vstv %s2239_s28 }
  0x96   : > { %v1009_v21 = vmul.f32 %v1008_v15, %v2230_v17  ;;  %1600 = vpow2.f32 %v991_v24  ;;  %v1021_v34 = vmul.f32 %v1020_v25, %v2230_v17  ;;  %s2255_s14 = sld [smem:[#allocation2 + $0x6]]  ;;  %v967_v46 = vsub.f32 %v965_v36, %v966_v37 }
  0x97   : > { %v1595_v23 = vpop.eup %1594  ;;  %s2258_s6 = sld [smem:[#allocation2 + $0x80]]  ;;  %v988_v53 = vsub.f32 %v986_v40, %v987_v41 }
  0x98   : > { %1010 = vadd.xlane.f32.xlu1 %v1009_v21  ;;  %v517_v26 = vadd.f32 1.0, %v1595_v23  ;;  %v1597_v28 = vpop.eup %1596  ;;  %s2260_s0 = sld [smem:[#allocation2 + $0x81]]  ;;  %v1415_v21 = vld [vmem:[%s2213_s12 + $0x8] sm:$0xff]  ;;  %v582_v24 = vstv %s2242_s29 }
  0x99   : > { %v2236_v32 = vadd.f32 1.0, %v1597_v28  ;;  %s2262_s18 = sld [smem:[#allocation2 + $0x82]]  ;;  %v574_v15 = vstv %s2247_s21 }
  0x9a   : > { %1602 = vrcp.f32 %v517_v26  ;;  %v527_v44 = vand.u32 2147483647, %v517_v26  ;;  %v529_v48 = vand.u32 2147483648, %v517_v26  ;;  %vm523_vm0 = vweird.f32 %v517_v26  ;;  %s2270_s20 = sld [smem:[#allocation2 + $0x83]] }
  0x9b   : > { %v1599_v29 = vpop.eup %1598  ;;  %1604 = vpow2.f32 %v554_v27  ;;  %vm543_vm4 = vweird.f32 %v2236_v32  ;;  %v549_v63 = vand.u32 2147483648, %v2236_v32  ;;  %s2279_s22 = sld [smem:[#allocation2 + $0x100]]  ;;  %v547_v2 = vand.u32 2147483647, %v2236_v32 }
  0x9c   : > { %v972_v31 = vadd.f32 1.0, %v1599_v29  ;;  %v1601_v38 = vpop.eup %1600  ;;  %vm2264_vm2 = vcmp.eq.f32.partialorder %v527_v44, 8.507059e+37  ;;  %v530_v62 = vor.u32 1.1754944e-38, %v529_v48  ;;  %s2282_s27 = sld [smem:[#allocation2 + $0x102]]  ;;  %p606_p6 = scmp.gt.f32.partialorder %s2255_s14, 0.5  ;;  %v580_v16 = vstv %s2249_s4 }
  0x9d   : > { %v993_v42 = vadd.f32 1.0, %v1601_v38  ;;  %s2287_s10 = sld [smem:[#allocation2 + $0x84]]  ;;  %v550_v14 = vor.u32 1.1754944e-38, %v549_v63  ;;  %vm548_vm7 = vcmp.eq.f32.partialorder %v547_v2, 8.507059e+37  ;;  %v624_v25 = vstv %s2258_s6 }
  0x9e   : > { %1606 = vlog2.f32 %v972_v31  ;;  %s2292_s11 = sld [smem:[#allocation2 + $0x101]]  ;;  %v630_v40 = vstv %s2260_s0 }
  0x9f   : > { %1608 = vrcp.f32 %v2236_v32  ;;  %s2305_s8 = sld [smem:[#allocation2 + $0x103]]  ;;  %v622_v29 = vstv %s2262_s18 }
  0xa0   : > { %1610 = vpow2.f32 %v557_v33  ;;  %1022 = vadd.xlane.f32.xlu1 %v1021_v34  ;;  %v1603_v39 = vpop.eup %1602  ;;  %s2307_s19 = sld [smem:[#allocation2 + $0x86]] }
  0xa1   : > { %v519_v43 = vmul.f32 %v1603_v39, %v517_v26  ;;  %v1605_v45 = vpop.eup %1604  ;;  %1612 = vlog2.f32 %v993_v42  ;;  %vm524_vm1 = vweird.f32 %v1603_v39  ;;  %s2314_s13 = sld [smem:[#allocation2 + $0x106]]  ;;  %v673_v33 = vstv %s2279_s22 }
  0xa2   : > { %v556_v57 = vmul.f32 %v1605_v45, %v1416_v47  ;;  %vm2273_vm3 = vmor %vm523_vm0, %vm524_vm1  ;;  %s2324_s7 = scalar_select %p606_p6, 1, 0  ;;  %v671_v37 = vstv %s2282_s27 }
  0xa3   : > { %v520_v50 = vsub.f32 1.0, %v519_v43  ;;  %s2329_s28 = sld [smem:[#allocation2 + $0x104]] }
  0xa4   : > { %v1607_v49 = vpop.eup %1606  ;;  %v560_v9 = vmul.f32 0.5, %v556_v57  ;;  %s2335_s29 = sld [smem:[#allocation2 + $0x182]]  ;;  %v679_v44 = vstv %s2292_s11 }
  0xa5   : > { %v1609_v51 = vpop.eup %1608  ;;  %v974_v52 = vmul.f32 0.6931472, %v1607_v49  ;;  %v521_v55 = vmul.f32 %v1603_v39, %v520_v50  ;;  %s2341_s21 = sld [smem:[#allocation2 + $0x180]]  ;;  %v677_v48 = vstv %s2305_s8 }
  0xa6   : > { %v1611_v54 = vpop.eup %1610  ;;  %v539_v58 = vmul.f32 %v1609_v51, %v2236_v32  ;;  %vm544_vm5 = vweird.f32 %v1609_v51  ;;  %v587_v32 = vstv %s2253_s26  ;;  %s2348_s4 = sld [smem:[#allocation2 + $0x183]]  ;;  %p655_p4 = scmp.gt.f32.partialorder %s2307_s19, 0.5 }
  0xa7   : > { %v975_v60 = vadd.f32 %v974_v52, %v967_v46  ;;  %v522_v0 = vadd.f32 %v1603_v39, %v521_v55  ;;  %v1613_v3 = vpop.eup %1612  ;;  %v559_v6 = vmul.f32 %v1611_v54, %v1417_v59  ;;  %vm2299_vm6 = vmor %vm543_vm4, %vm544_vm5  ;;  %s2353_s26 = sld [smem:[#allocation2 + $0x181]]  ;;  %v635_v52 = vstv %s2287_s10  ;;  %p704_p11 = scmp.gt.f32.partialorder %s2314_s13, 0.5 }
  0xa8   : > { %v540_v1 = vsub.f32 1.0, %v539_v58  ;;  %v995_v10 = vmul.f32 0.6931472, %v1613_v3  ;;  %s2355_s14 = sld [smem:[#allocation2 + $0x5]] }
  0xa9   : > { %v976_v4 = vmul.f32 %v975_v60, %v2230_v17  ;;  %v526_v8 = vsel %vm2273_vm3, %v1603_v39, %v522_v0  ;;  %v563_v22 = vmul.f32 0.5, %v559_v6  ;;  %v2310_v23 = vmul.f32 %v559_v6, %v556_v57  ;;  %s2362_s6 = sld [smem:[#allocation2 + $0x85]] }
  0xaa   : > { %v541_v11 = vmul.f32 %v1609_v51, %v540_v1  ;;  %v531_v12 = vsel %vm2264_vm2, %v530_v62, %v526_v8  ;;  %v996_v19 = vadd.f32 %v995_v10, %v988_v53  ;;  %s2366_s0 = sld [smem:[#allocation2 + $0x105]]  ;;  %v720_v2 = vstv %s2335_s29 }
  0xab   : > { %977 = vadd.xlane.f32.xlu0 %v976_v4  ;;  %v533_v18 = vadd.f32 %v531_v12, %v505_v5  ;;  %v588_v59 = vadd.f32 %v587_v32, %v2310_v23  ;;  %v636_v62 = vadd.f32 %v635_v52, %v2310_v23  ;;  %s2372_s18 = sld [smem:[#allocation2 + $0x184]]  ;;  %v684_v4 = vstv %s2329_s28  ;;  %v2451_v52 = vld [vmem:[%s2213_s12 + $0x20] sm:$0xff] }
  0xac   : > { %v542_v20 = vadd.f32 %v1609_v51, %v541_v11  ;;  %v997_v30 = vmul.f32 %v996_v19, %v2230_v17  ;;  %v628_v17 = vstv %s2270_s20  ;;  %s2376_s20 = scalar_select %p655_p4, 1, 0  ;;  %v722_v6 = vstv %s2341_s21 }
  0xad   : > { %v2316_v26 = vsub.f32 %v533_v18, %v560_v9  ;;  %v2318_v27 = vadd.f32 %v560_v9, %v533_v18  ;;  %s2382_s22 = scalar_select %p704_p11, 1, 0  ;;  %v726_v10 = vstv %s2348_s4  ;;  %v728_v12 = vstv %s2353_s26 }
  0xae   : > { %v546_v28 = vsel %vm2299_vm6, %v1609_v51, %v542_v20  ;;  %s2390_s27 = sld [smem:[#allocation2 + $0x200]] }
  0xaf   : > { %v551_v31 = vsel %vm548_vm7, %v550_v14, %v546_v28  ;;  %v575_v35 = vmin.f32 %v574_v15, %v2318_v27  ;;  %v577_v36 = vmax.f32 %v576_v7, %v2316_v26  ;;  %v623_v38 = vmin.f32 %v622_v29, %v2318_v27  ;;  %s2395_s10 = sld [smem:[#allocation2 + $0x202]] }
  0xb0   : > { %v553_v34 = vadd.f32 %v1415_v21, %v551_v31  ;;  %v625_v39 = vmax.f32 %v624_v25, %v2316_v26  ;;  %v672_v46 = vmin.f32 %v671_v37, %v2318_v27  ;;  %v674_v47 = vmax.f32 %v673_v33, %v2316_v26  ;;  %s2403_s11 = sld [smem:[#allocation2 + $0x203]] }
  0xb1   : > { %v578_v43 = vsub.f32 %v575_v35, %v577_v36  ;;  %v721_v5 = vmin.f32 %v720_v2, %v2318_v27  ;;  %v723_v9 = vmax.f32 %v722_v6, %v2316_v26  ;;  %v685_v15 = vadd.f32 %v684_v4, %v2310_v23  ;;  %s2412_s8 = sld [smem:[#allocation2 + $0x201]] }
  0xb2   : > { %v2343_v41 = vsub.f32 %v553_v34, %v563_v22  ;;  %v2345_v42 = vadd.f32 %v563_v22, %v553_v34  ;;  %v626_v45 = vsub.f32 %v623_v38, %v625_v39  ;;  %v675_v54 = vsub.f32 %v672_v46, %v674_v47  ;;  %s2426_s19 = sld [smem:[#allocation2 + $0x186]] }
  0xb3   : > { %998 = vadd.xlane.f32.xlu0 %v997_v30  ;;  %v579_v55 = vmax.f32 %v578_v43, 0.0  ;;  %v724_v18 = vsub.f32 %v721_v5, %v723_v9  ;;  %v607_v21 = vstv %s2355_s14  ;;  %v610_v22 = vstv %s2324_s7  ;;  %s2432_s13 = sld [smem:[#allocation2 + $0x204]] }
  0xb4   : > { %v581_v49 = vmin.f32 %v580_v16, %v2345_v42  ;;  %v583_v50 = vmax.f32 %v582_v24, %v2343_v41  ;;  %v629_v51 = vmin.f32 %v628_v17, %v2345_v42  ;;  %v631_v53 = vmax.f32 %v630_v40, %v2343_v41  ;;  %s2448_s7 = sld [smem:[#allocation2 + $0x280]] }
  0xb5   : > { %v678_v57 = vmin.f32 %v677_v48, %v2345_v42  ;;  %v680_v58 = vmax.f32 %v679_v44, %v2343_v41  ;;  %v627_v60 = vmax.f32 %v626_v45, 0.0  ;;  %v676_v0 = vmax.f32 %v675_v54, 0.0  ;;  %s2455_s28 = sld [smem:[#allocation2 + $0x282]] }
  0xb6   : > { %v584_v56 = vsub.f32 %v581_v49, %v583_v50  ;;  %v632_v61 = vsub.f32 %v629_v51, %v631_v53  ;;  %v727_v19 = vmin.f32 %v726_v10, %v2345_v42  ;;  %v729_v20 = vmax.f32 %v728_v12, %v2343_v41  ;;  %s2483_s12 = sld [smem:[#allocation2 + $0x185]] }
  0xb7   : > { %v681_v1 = vsub.f32 %v678_v57, %v680_v58  ;;  %v656_v24 = vstv %s2362_s6  ;;  %v733_v25 = vstv %s2372_s18  ;;  %v659_v28 = vstv %s2376_s20  ;;  %s2494_s29 = sld [smem:[#allocation2 + $0x206]] }
  0xb8   : > { %v585_v63 = vmax.f32 %v584_v56, 0.0  ;;  %v633_v3 = vmax.f32 %v632_v61, 0.0  ;;  %v705_v30 = vstv %s2366_s0  ;;  %v708_v31 = vstv %s2382_s22  ;;  %p753_p0 = scmp.gt.f32.partialorder %s2426_s19, 0.5  ;;  %s2504_s21 = sld [smem:[#allocation2 + $0x281]] }
  0xb9   : > { %v682_v8 = vmax.f32 %v681_v1, 0.0  ;;  %v725_v34 = vmax.f32 %v724_v18, 0.0  ;;  %v730_v35 = vsub.f32 %v727_v19, %v729_v20  ;;  %v734_v36 = vadd.f32 %v733_v25, %v2310_v23  ;;  %s2509_s4 = sld [smem:[#allocation2 + $0x283]] }
  0xba   : > { %v2386_v7 = vmul.f32 %v585_v63, %v579_v55  ;;  %v2392_v11 = vmul.f32 %v633_v3, %v627_v60  ;;  %v769_v39 = vstv %s2395_s10  ;;  %v771_v17 = vstv %s2390_s27  ;;  %s2524_s26 = scalar_select %p753_p0, 1, 0 }
  0xbb   : > { %v2400_v14 = vmul.f32 %v682_v8, %v676_v0  ;;  %v731_v38 = vmax.f32 %v730_v35, 0.0  ;;  %v770_v44 = vmin.f32 %v769_v39, %v2318_v27  ;;  %v772_v45 = vmax.f32 %v771_v17, %v2316_v26  ;;  %s2533_s14 = sld [smem:[#allocation2 + $0x284]]  ;;  %s2554_s10 = scalar_lea.vmem [#allocation14], %s1400_s15 }
  0xbc   : > { %v2398_v13 = vsub.f32 %v588_v59, %v2386_v7  ;;  %v2406_v16 = vsub.f32 %v636_v62, %v2392_v11  ;;  %v775_v46 = vstv %s2403_s11  ;;  %v777_v55 = vstv %s2412_s8  ;;  %s2541_s18 = sld [smem:[#allocation2 + $0x300]] }
  0xbd   : > { %v2420_v29 = vsub.f32 %v685_v15, %v2400_v14  ;;  %v2446_v51 = vmul.f32 %v731_v38, %v725_v34  ;;  %v773_v54 = vsub.f32 %v770_v44, %v772_v45  ;;  %v776_v58 = vmin.f32 %v775_v46, %v2345_v42  ;;  %s2550_s27 = sld [smem:[#allocation2 + $0x302]]  ;;  %p802_p3 = scmp.gt.f32.partialorder %s2494_s29, 0.5 }
  0xbe   : > { %1614 = vrcp.f32 %v2398_v13  ;;  %v599_v32 = vand.u32 2147483647, %v2398_v13  ;;  %v601_v33 = vand.u32 2147483648, %v2398_v13  ;;  %vm595_vm8 = vweird.f32 %v2398_v13  ;;  %s2560_s11 = sld [smem:[#allocation2 + $0x301]] }
  0xbf   : > { %1616 = vrcp.f32 %v2406_v16  ;;  %vm643_vm9 = vweird.f32 %v2406_v16  ;;  %v647_v37 = vand.u32 2147483647, %v2406_v16  ;;  %v649_v43 = vand.u32 2147483648, %v2406_v16  ;;  %s2568_s15 = sld [smem:[#allocation2 + $0x303]] }
  0xc0   : > { %1618 = vrcp.f32 %v2420_v29  ;;  %vm2442_vm10 = vcmp.eq.f32.partialorder %v599_v32, 8.507059e+37  ;;  %v602_v50 = vor.u32 1.1754944e-38, %v601_v33  ;;  %v2458_v57 = vsub.f32 %v734_v36, %v2446_v51  ;;  %s2606_s6 = sld [smem:[#allocation2 + $0x205]] }
  0xc1   : > { %v778_v59 = vmax.f32 %v777_v55, %v2343_v41  ;;  %v696_v62 = vand.u32 2147483647, %v2420_v29  ;;  %v698_v63 = vand.u32 2147483648, %v2420_v29  ;;  %vm2465_vm13 = vcmp.eq.f32.partialorder %v607_v21, %v2451_v52  ;;  %s2615_s0 = sld [smem:[#allocation2 + $0x304]] }
  0xc2   : > { %vm2469_vm14 = vcmp.eq.s32.totalorder %v610_v22, 1  ;;  %v650_v3 = vor.u32 1.1754944e-38, %v649_v43  ;;  %1620 = vrcp.f32 %v2458_v57  ;;  %vm692_vm0 = vweird.f32 %v2420_v29  ;;  %s2624_s20 = sld [smem:[#allocation2 + $0x286]] }
  0xc3   : > { %v774_v8 = vmax.f32 %v773_v54, 0.0  ;;  %v782_v9 = vstv %s2432_s13  ;;  %v779_v15 = vsub.f32 %v776_v58, %v778_v59  ;;  %vm2496_vm3 = vcmp.eq.f32.partialorder %v647_v37, 8.507059e+37  ;;  %s2634_s22 = sld [smem:[#allocation2 + $0x382]] }
  0xc4   : > { %v1615_v40 = vpop.eup %1614  ;;  %vm2500_vm4 = vcmp.eq.f32.partialorder %v696_v62, 8.507059e+37  ;;  %v783_v32 = vadd.f32 %v782_v9, %v2310_v23  ;;  %v818_v36 = vstv %s2455_s28  ;;  %v820_v37 = vstv %s2448_s7  ;;  %s2638_s8 = scalar_select %p802_p3, 1, 0 }
  0xc5   : > { %v1617_v47 = vpop.eup %1616  ;;  %v591_v48 = vmul.f32 %v1615_v40, %v2398_v13  ;;  %vm596_vm11 = vweird.f32 %v1615_v40  ;;  %v780_v25 = vmax.f32 %v779_v15, 0.0  ;;  %vm741_vm6 = vweird.f32 %v2458_v57  ;;  %s2647_s19 = sld [smem:[#allocation2 + $0x380]] }
  0xc6   : > { %v639_v53 = vmul.f32 %v1617_v47, %v2406_v16  ;;  %v1619_v60 = vpop.eup %1618  ;;  %vm644_vm12 = vweird.f32 %v1617_v47  ;;  %vm2478_vm15 = vmor %vm595_vm8, %vm596_vm11  ;;  %v699_v16 = vor.u32 1.1754944e-38, %v698_v63  ;;  %v747_v45 = vand.u32 2147483648, %v2458_v57  ;;  %s2652_s13 = sld [smem:[#allocation2 + $0x381]] }
  0xc7   : > { %v592_v56 = vsub.f32 1.0, %v591_v48  ;;  %v688_v4 = vmul.f32 %v1619_v60, %v2420_v29  ;;  %vm2490_vm1 = vmor %vm643_vm9, %vm644_vm12  ;;  %vm693_vm2 = vweird.f32 %v1619_v60  ;;  %v2531_v43 = vmul.f32 %v780_v25, %v774_v8  ;;  %s2660_s7 = sld [smem:[#allocation2 + $0x383]] }
  0xc8   : > { %v640_v61 = vsub.f32 1.0, %v639_v53  ;;  %vm2518_vm5 = vmor %vm692_vm0, %vm693_vm2  ;;  %v1621_v38 = vpop.eup %1620  ;;  %vm2577_vm9 = vcmp.eq.f32.partialorder %v656_v24, %v2451_v52  ;;  %vm2590_vm11 = vcmp.eq.f32.partialorder %v705_v30, %v2451_v52  ;;  %vm2596_vm12 = vcmp.eq.s32.totalorder %v708_v31, 1  ;;  %s2675_s28 = sld [smem:[#allocation2 + $0x306]]  ;;  %p851_p13 = scmp.gt.f32.partialorder %s2624_s20, 0.5 }
  0xc9   : > { %v593_v0 = vmul.f32 %v1615_v40, %v592_v56  ;;  %v689_v13 = vsub.f32 1.0, %v688_v4  ;;  %v737_v44 = vmul.f32 %v1621_v38, %v2458_v57  ;;  %v2546_v46 = vsub.f32 %v783_v32, %v2531_v43  ;;  %vm612_vm8 = vmand %vm2469_vm14, %vm2465_vm13  ;;  %s2695_s29 = sld [smem:[#allocation2 + $0x285]]  ;;  %s1178_s20 = sshll.u32 %s2554_s10, 4  ;;  %s1179_s20 = int_to_ptr.vmem [resolvable:$true] %s1178_s20 }
  0xca   : > { %v641_v6 = vmul.f32 %v1617_v47, %v640_v61  ;;  %vm742_vm7 = vweird.f32 %v1621_v38  ;;  %v824_v59 = vstv %s2509_s4  ;;  %v754_v61 = vstv %s2483_s12  ;;  %s2680_s12 = sld [smem:[#allocation2 + $0x384]] }
  0xcb   : > { %v594_v10 = vadd.f32 %v1615_v40, %v593_v0  ;;  %v690_v22 = vmul.f32 %v1619_v60, %v689_v13  ;;  %v738_v49 = vsub.f32 1.0, %v737_v44  ;;  %1622 = vrcp.f32 %v2546_v46  ;;  %s2722_s4 = sld [smem:[#allocation2 + $0x386]] }
  0xcc   : > { %v642_v18 = vadd.f32 %v1617_v47, %v641_v6  ;;  %v757_v62 = vstv %s2524_s26  ;;  %v825_v63 = vmin.f32 %v824_v59, %v2345_v42  ;;  %v794_v2 = vand.u32 2147483647, %v2546_v46  ;;  %s2728_s26 = scalar_select %p851_p13, 1, 0 }
  0xcd   : > { %v598_v21 = vsel %vm2478_vm15, %v1615_v40, %v594_v10  ;;  %v691_v40 = vadd.f32 %v1619_v60, %v690_v22  ;;  %v739_v55 = vmul.f32 %v1621_v38, %v738_v49  ;;  %vm2602_vm15 = vmor %vm741_vm6, %vm742_vm7  ;;  %v796_v1 = vand.u32 2147483648, %v2546_v46 }
  0xce   : > { %v603_v33 = vsel %vm2442_vm10, %v602_v50, %v598_v21  ;;  %v646_v34 = vsel %vm2490_vm1, %v1617_v47, %v642_v18  ;;  %v819_v47 = vmin.f32 %v818_v36, %v2318_v27  ;;  %v745_v50 = vand.u32 2147483647, %v2458_v57  ;;  %p900_p12 = scmp.gt.f32.partialorder %s2675_s28, 0.5 }
  0xcf   : > { %v604_v39 = vmul.f32 %v603_v33, %v2386_v7  ;;  %v651_v17 = vsel %vm2496_vm3, %v650_v3, %v646_v34  ;;  %v695_v7 = vsel %vm2518_vm5, %v1619_v60, %v691_v40  ;;  %vm2583_vm10 = vcmp.eq.s32.totalorder %v659_v28, 1  ;;  %vm710_vm5 = vmand %vm2596_vm12, %vm2590_vm11 }
  0xd0   : > { %v2536_v29 = vmul.f32 %v651_v17, %v2392_v11  ;;  %v821_v11 = vmax.f32 %v820_v37, %v2316_v26  ;;  %v700_v48 = vsel %vm2500_vm4, %v699_v16, %v695_v7  ;;  %v748_v28 = vor.u32 1.1754944e-38, %v747_v45  ;;  %vm661_vm13 = vmand %vm2583_vm10, %vm2577_vm9 }
  0xd1   : > { %605 = vst [vmem:[%s2554_s10] sm:$0xff] %v604_v39  ;;  %v2565_v53 = vmul.f32 %v700_v48, %v2400_v14  ;;  %v826_v60 = vstv %s2504_s21  ;;  %v740_v31 = vadd.f32 %v1621_v38, %v739_v55  ;;  %vm746_vm0 = vcmp.eq.f32.partialorder %v745_v50, 8.507059e+37  ;;  %v1623_v5 = vpop.eup %1622  ;;  %s2712_s21 = sld [smem:[#allocation2 + $0x305]]  ;;  %p949_p1 = scmp.gt.f32.partialorder %s2722_s4, 0.5 }
  0xd2   : > { %1434 = vst [vmem:[%s2554_s10 + $0x8] sm:$0xff] %v2536_v29  ;;  %v822_v30 = vsub.f32 %v819_v47, %v821_v11  ;;  %v2622_v57 = vsel %vm612_vm8, %v604_v39, 0.0  ;;  %v827_v0 = vmax.f32 %v826_v60, %v2343_v41  ;;  %v831_v3 = vstv %s2533_s14  ;;  %s1402_s14 = sshll.u32 %s2184_s9, 3 }
  0xd3   : > { %1442 = vst [vmem:[%s2554_s10 + $0x10] sm:$0xff] %v2565_v53  ;;  %v744_v4 = vsel %vm2602_vm15, %v1621_v38, %v740_v31  ;;  %vm790_vm1 = vweird.f32 %v2546_v46  ;;  %v867_v10 = vstv %s2550_s27  ;;  %v786_v13 = vmul.f32 %v1623_v5, %v2546_v46  ;;  %s2777_s27 = sld [smem:[#allocation2 + $0x385]] }
  0xd4   : > { %v749_v6 = vsel %vm746_vm0, %v748_v28, %v744_v4  ;;  %v823_v8 = vmax.f32 %v822_v30, 0.0  ;;  %v828_v9 = vsub.f32 %v825_v63, %v827_v0  ;;  %v832_v15 = vadd.f32 %v831_v3, %v2310_v23 }
  0xd5   : > { %v2642_v12 = vmul.f32 %v749_v6, %v2446_v51  ;;  %v868_v18 = vmin.f32 %v867_v10, %v2318_v27  ;;  %v869_v20 = vstv %s2541_s18  ;;  %v873_v16 = vstv %s2568_s15  ;;  %s2773_s18 = scalar_select %p900_p12, 1, 0 }
  0xd6   : > { %v829_v19 = vmax.f32 %v828_v9, 0.0  ;;  %v875_v21 = vstv %s2560_s11  ;;  %v787_v51 = vsub.f32 1.0, %v786_v13  ;;  %vm791_vm14 = vweird.f32 %v1623_v5  ;;  %s2824_s11 = scalar_select %p949_p1, 1, 0 }
  0xd7   : > { %v870_v22 = vmax.f32 %v869_v20, %v2316_v26  ;;  %v874_v25 = vmin.f32 %v873_v16, %v2345_v42  ;;  %1450 = vst [vmem:[%s2554_s10 + $0x18] sm:$0xff] %v2642_v12  ;;  %vm2665_vm2 = vcmp.eq.f32.partialorder %v754_v61, %v2451_v52  ;;  %vm2669_vm3 = vcmp.eq.s32.totalorder %v757_v62, 1  ;;  %vm2691_vm4 = vmor %vm790_vm1, %vm791_vm14  ;;  %s3116_s15 = sld [smem:[#allocation32_spill]] }
  0xd8   : > { %v2673_v34 = vmul.f32 %v829_v19, %v823_v8  ;;  %v876_v35 = vmax.f32 %v875_v21, %v2343_v41  ;;  %v614_v36 = vmax.f32 %v2622_v57, 0.0  ;;  %v788_v37 = vmul.f32 %v1623_v5, %v787_v51  ;;  %vm759_vm7 = vmand %vm2669_vm3, %vm2665_vm2 }
  0xd9   : > { %v871_v38 = vsub.f32 %v868_v18, %v870_v22  ;;  %v880_v39 = vstv %s2615_s0  ;;  %v662_v17 = vsel %vm661_vm13, %v2536_v29, 0.0  ;;  %v797_v44 = vor.u32 1.1754944e-38, %v796_v1 }
  0xda   : > { %v2698_v45 = vsub.f32 %v832_v15, %v2673_v34  ;;  %v877_v7 = vsub.f32 %v874_v25, %v876_v35  ;;  %v789_v29 = vadd.f32 %v1623_v5, %v788_v37  ;;  %vm795_vm6 = vcmp.eq.f32.partialorder %v794_v2, 8.507059e+37 }
  0xdb   : > { %v872_v46 = vmax.f32 %v871_v38, 0.0  ;;  %v916_v47 = vstv %s2634_s22  ;;  %v803_v11 = vstv %s2606_s6  ;;  %v806_v48 = vstv %s2638_s8  ;;  %s1153_s22 = scalar_lea.sflag [#allocation15], %s2184_s9 }
  0xdc   : > { %1624 = vrcp.f32 %v2698_v45  ;;  %v881_v49 = vadd.f32 %v880_v39, %v2310_v23  ;;  %v793_v50 = vsel %vm2691_vm4, %v1623_v5, %v789_v29  ;;  %v878_v54 = vmax.f32 %v877_v7, 0.0  ;;  %v2767_v5 = vld [vmem:[%s2188_s23 + $0x20] sm:$0xff]  ;;  %s2783_s23 = scalar_lea.vmem [#allocation13], %s1402_s14 }
  0xdd   : > { %v917_v14 = vmin.f32 %v916_v47, %v2318_v27  ;;  %v918_v55 = vstv %s2647_s19  ;;  %v663_v24 = vmax.f32 %v614_v36, %v662_v17  ;;  %v711_v28 = vsel %vm710_vm5, %v2565_v53, 0.0  ;;  %v2835_v47 = vld [vmem:[%s2196_s17] sm:$0xff]  ;;  %s1836_s28 = scalar_lea.hbm %s3116_s15, 128 }
  0xde   : > { %v798_v30 = vsel %vm795_vm6, %v797_v44, %v793_v50  ;;  %v919_v59 = vmax.f32 %v918_v55, %v2316_v26  ;;  %v2730_v27 = vmul.f32 %v878_v54, %v872_v46  ;;  %v922_v58 = vstv %s2660_s7  ;;  %v2844_v54 = vld [vmem:[%s2196_s17 + $0x10] sm:$0xff] }
  0xdf   : > { %v799_v60 = vmul.f32 %v798_v30, %v2531_v43  ;;  %v924_v31 = vstv %s2652_s13  ;;  %v923_v26 = vmin.f32 %v922_v58, %v2345_v42  ;;  %vm2743_vm8 = vcmp.eq.f32.partialorder %v803_v11, %v2451_v52  ;;  %v2838_v11 = vld [vmem:[%s2196_s17 + $0x8] sm:$0xff] }
  0xe0   : > { %v920_v53 = vsub.f32 %v917_v14, %v919_v59  ;;  %v925_v43 = vmax.f32 %v924_v31, %v2343_v41  ;;  %vm2747_vm9 = vcmp.eq.s32.totalorder %v806_v48, 1  ;;  %v2752_v62 = vsub.f32 %v881_v49, %v2730_v27  ;;  %v2847_v14 = vld [vmem:[%s2196_s17 + $0x18] sm:$0xff]  ;;  %s1486_s17 = sshll.u32 %s2080_s2, 3 }
  0xe1   : > { %v929_v57 = vstv %s2680_s12  ;;  %1458 = vst [vmem:[%s2554_s10 + $0x20] sm:$0xff] %v799_v60  ;;  %v712_v63 = vmax.f32 %v663_v24, %v711_v28  ;;  %v852_v41 = vstv %s2695_s29  ;;  %v760_v4 = vsel %vm759_vm7, %v2642_v12, 0.0  ;;  %vm808_vm12 = vmand %vm2747_vm9, %vm2743_vm8  ;;  %s1177_s6 = scalar_lea.hbm %s3116_s15, %s1486_s17 }
  0xe2   : > { %v1625_v42 = vpop.eup %1624  ;;  %v921_v0 = vmax.f32 %v920_v53, 0.0  ;;  %v926_v3 = vsub.f32 %v923_v26, %v925_v43  ;;  %v855_v1 = vstv %s2728_s26  ;;  %1626 = vrcp.f32 %v2752_v62  ;;  %s1180_s0 = sshll.u32 %s1177_s6, 4  ;;  %s1181_s0 = int_to_ptr.hbm [resolvable:$true] %s1180_s0 }
  0xe3   : > { %v835_v2 = vmul.f32 %v1625_v42, %v2698_v45  ;;  %vm839_vm10 = vweird.f32 %v2698_v45  ;;  %v845_v6 = vand.u32 2147483648, %v2698_v45  ;;  %v930_v9 = vadd.f32 %v929_v57, %v2310_v23  ;;  %s1830_s8 = sshra.s32 %s1181_s0, 4  ;;  %s1831_s8 = int_to_ptr.hbm [resolvable:$true] %s1830_s8 }
  0xe4   : > { %v927_v8 = vmax.f32 %v926_v3, 0.0  ;;  %vm840_vm11 = vweird.f32 %v1625_v42  ;;  %v843_v12 = vand.u32 2147483647, %v2698_v45  ;;  %v901_v13 = vstv %s2712_s21  ;;  %s1832_s19 = scalar_lea.hbm %s1831_s8, 64  ;;  %p1837_p10 = scmp.lt.s32.totalorder %s1831_s8, %s3116_s15 }
  0xe5   : > { %v836_v10 = vsub.f32 1.0, %v835_v2  ;;  %v1932_v18 = vmov 0.0   ;;  %vm2792_vm15 = vcmp.eq.f32.partialorder %v852_v41, %v2451_v52  ;;  %vm2796_vm0 = vcmp.eq.s32.totalorder %v855_v1, 1  ;;  %vm2806_vm1 = vmor %vm839_vm10, %vm840_vm11  ;;  %p1833_p2 = scmp.ne.s32.totalorder %s1831_s8, %s1832_s19  ;;  %p1838_p6 = scmp.lt.s32.totalorder %s1836_s28, %s1832_s19 }
  0xe6   : > { %v2780_v15 = vmul.f32 %v927_v8, %v921_v0  ;;  %1146 = vst [vmem:[%s2783_s23 + $0x7] sm:$0x1] %v1932_v18  ;;  %v1034_v16 = vand.u32 2147483647, %v2767_v5  ;;  %v2801_v21 = vmax.f32 %v712_v63, %v760_v4  ;;  %v846_v22 = vor.u32 1.1754944e-38, %v845_v6  ;;  %vm857_vm5 = vmand %vm2796_vm0, %vm2792_vm15 }
  0xe7   : > { %v837_v23 = vmul.f32 %v1625_v42, %v836_v10  ;;  %v904_v25 = vstv %s2773_s18  ;;  %vm844_vm13 = vcmp.eq.f32.partialorder %v843_v12, 8.507059e+37  ;;  %vm2815_vm14 = vcmp.eq.f32.partialorder %v901_v13, %v2451_v52  ;;  %p1834_p5 = pnand %p1833_p2, %p2097_p7  ;;  %p1839_p4 = por %p1838_p6, %p1837_p10 }
  0xe8   : > { %v2812_v32 = vsub.f32 %v930_v9, %v2780_v15  ;;  %v1627_v33 = vpop.eup %1626  ;;  %v1035_v37 = vsub.f32 0.0, %v1034_v16  ;;  %v809_v38 = vsel %vm808_vm12, %v799_v60, 0.0  ;;  %v892_v17 = vand.u32 2147483647, %v2752_v62 }
  0xe9   : > { %v838_v35 = vadd.f32 %v1625_v42, %v837_v23  ;;  %v884_v39 = vmul.f32 %v1627_v33, %v2752_v62  ;;  %v894_v44 = vand.u32 2147483648, %v2752_v62  ;;  %vm2829_vm2 = vcmp.eq.s32.totalorder %v904_v25, 1  ;;  %v2908_v25 = vld [vmem:[%s2205_s16] sm:$0xff]  ;;  %p1835_p8 = pneg %p1834_p5 }
  0xea   : > { %1628 = vrcp.f32 %v2812_v32  ;;  %v1036_v7 = vmul.f32 1.442695, %v1035_v37  ;;  %vm888_vm3 = vweird.f32 %v2752_v62  ;;  %vm889_vm4 = vweird.f32 %v1627_v33  ;;  %vm906_vm10 = vmand %vm2829_vm2, %vm2815_vm14 }
  0xeb   : > { %v842_v40 = vsel %vm2806_vm1, %v1625_v42, %v838_v35  ;;  %v885_v46 = vsub.f32 1.0, %v884_v39  ;;  %v810_v48 = vmax.f32 %v2801_v21, %v809_v38  ;;  %v950_v50 = vstv %s2777_s27  ;;  %vm2861_vm7 = vmor %vm888_vm3, %vm889_vm4  ;;  %v1057_v39 = vld [vmem:[%s2207_s24] sm:$0xff]  ;;  %p1840_p11 = pnand %p1839_p4, %p1835_p8 }
  0xec   : > { %v847_v29 = vsel %vm844_vm13, %v846_v22, %v842_v40  ;;  %1630 = vpow2.f32 %v1036_v7  ;;  %vm2853_vm6 = vcmp.eq.f32.partialorder %v892_v17, 8.507059e+37  ;;  %v941_v28 = vand.u32 2147483647, %v2812_v32 }
  0xed   : > { %v848_v49 = vmul.f32 %v847_v29, %v2673_v34  ;;  %v886_v55 = vmul.f32 %v1627_v33, %v885_v46  ;;  %v953_v30 = vstv %s2824_s11  ;;  %v895_v59 = vor.u32 1.1754944e-38, %v894_v44  ;;  %v1058_v46 = vld [vmem:[%s2207_s24 + $0x8] sm:$0xff] }
  0xee   : > { %vm937_vm8 = vweird.f32 %v2812_v32  ;;  %v1073_v60 = vand.u32 2147483647, %v2835_v47  ;;  %v1074_v58 = vand.u32 2147483647, %v2838_v11  ;;  %v943_v26 = vand.u32 2147483648, %v2812_v32 }
  0xef   : > { %1466 = vst [vmem:[%s2554_s10 + $0x28] sm:$0xff] %v848_v49  ;;  %v887_v53 = vadd.f32 %v1627_v33, %v886_v55  ;;  %v1075_v43 = vand.u32 2147483647, %v2844_v54  ;;  %v1076_v56 = vand.u32 2147483647, %v2847_v14  ;;  %v858_v61 = vsel %vm857_vm5, %v848_v49, 0.0 }
  0xf0   : > { %v1629_v31 = vpop.eup %1628  ;;  %v1077_v57 = vsub.f32 0.0, %v1073_v60  ;;  %v1078_v42 = vsub.f32 0.0, %v1074_v58  ;;  %vm2888_vm11 = vcmp.eq.f32.partialorder %v950_v50, %v2451_v52  ;;  %v859_v19 = vmax.f32 %v810_v48, %v858_v61  ;;  %v1408_v50 = vld [vmem:[%s2205_s16 + $0x8] sm:$0xff]  ;;  %v1059_v55 = vld [vmem:[%s2207_s24 + $0x10] sm:$0xff] }
  0xf1   : > { %v933_v62 = vmul.f32 %v1629_v31, %v2812_v32  ;;  %v891_v63 = vsel %vm2861_vm7, %v1627_v33, %v887_v53  ;;  %vm938_vm9 = vweird.f32 %v1629_v31  ;;  %v1079_v41 = vsub.f32 0.0, %v1075_v43 }
  0xf2   : > { %v1080_v0 = vsub.f32 0.0, %v1076_v56  ;;  %v1631_v3 = vpop.eup %1630  ;;  %v896_v4 = vsel %vm2853_vm6, %v895_v59, %v891_v63  ;;  %v1081_v1 = vmul.f32 1.442695, %v1077_v57  ;;  %v1083_v6 = vmul.f32 1.442695, %v1078_v42  ;;  %vm2895_vm12 = vmor %vm937_vm8, %vm938_vm9 }
  0xf3   : > { %v934_v2 = vsub.f32 1.0, %v933_v62  ;;  %v897_v8 = vmul.f32 %v896_v4, %v2730_v27  ;;  %v1038_v9 = vadd.f32 1.0, %v1631_v3  ;;  %v1085_v10 = vmul.f32 1.442695, %v1079_v41 }
  0xf4   : > { %1632 = vpow2.f32 %v1081_v1  ;;  %v1087_v23 = vmul.f32 1.442695, %v1080_v0  ;;  %v944_v20 = vor.u32 1.1754944e-38, %v943_v26  ;;  %vm2899_vm15 = vcmp.eq.s32.totalorder %v953_v30, 1  ;;  %v1060_v30 = vld [vmem:[%s2207_s24 + $0x18] sm:$0xff] }
  0xf5   : > { %v935_v12 = vmul.f32 %v1629_v31, %v934_v2  ;;  %1634 = vlog2.f32 %v1038_v9  ;;  %1474 = vst [vmem:[%s2554_s10 + $0x30] sm:$0xff] %v897_v8  ;;  %v907_v52 = vsel %vm906_vm10, %v897_v8, 0.0  ;;  %vm942_vm0 = vcmp.eq.f32.partialorder %v941_v28, 8.507059e+37  ;;  %vm955_vm1 = vmand %vm2899_vm15, %vm2888_vm11 }
  0xf6   : > { %1636 = vpow2.f32 %v1083_v6  ;;  %v1031_v22 = vmax.f32 %v2767_v5, 0.0  ;;  %v1032_v32 = vmul.f32 %v2908_v25, %v2767_v5  ;;  %v908_v33 = vmax.f32 %v859_v19, %v907_v52 }
  0xf7   : > { %v936_v21 = vadd.f32 %v1629_v31, %v935_v12  ;;  %1638 = vpow2.f32 %v1085_v10  ;;  %v1065_v24 = vmul.f32 %v1057_v39, %v2835_v47  ;;  %v1062_v34 = vmax.f32 %v2838_v11, 0.0 }
  0xf8   : > { %1640 = vpow2.f32 %v1087_v23  ;;  %v1033_v5 = vsub.f32 %v1031_v22, %v1032_v32  ;;  %v1063_v58 = vmax.f32 %v2844_v54, 0.0  ;;  %v1067_v43 = vmul.f32 %v1059_v55, %v2844_v54 }
  0xf9   : > { %v940_v51 = vsel %vm2895_vm12, %v1629_v31, %v936_v21  ;;  %v1066_v31 = vmul.f32 %v1058_v46, %v2838_v11  ;;  %v1068_v56 = vmul.f32 %v1060_v30, %v2847_v14 }
  0xfa   : > { %v945_v35 = vsel %vm942_vm0, %v944_v20, %v940_v51  ;;  %v1633_v36 = vpop.eup %1632  ;;  %v1071_v0 = vsub.f32 %v1063_v58, %v1067_v43 }
  0xfb   : > { %v946_v37 = vmul.f32 %v945_v35, %v2780_v15  ;;  %v1635_v38 = vpop.eup %1634  ;;  %v1089_v17 = vadd.f32 1.0, %v1633_v36  ;;  %v1061_v15 = vmax.f32 %v2835_v47, 0.0  ;;  %v1064_v47 = vmax.f32 %v2847_v14, 0.0 }
  0xfc   : > { %v1637_v40 = vpop.eup %1636  ;;  %v1040_v29 = vmul.f32 0.6931472, %v1635_v38  ;;  %v1070_v42 = vsub.f32 %v1062_v34, %v1066_v31 }
  0xfd   : > { %v956_v44 = vsel %vm955_vm1, %v946_v37, 0.0  ;;  %1482 = vst [vmem:[%s2554_s10 + $0x38] sm:$0xff] %v946_v37  ;;  %v1639_v45 = vpop.eup %1638  ;;  %v1090_v48 = vadd.f32 1.0, %v1637_v40  ;;  %1642 = vlog2.f32 %v1089_v17  ;;  %v1069_v61 = vsub.f32 %v1061_v15, %v1065_v24 }
  0xfe   : > { %v957_v7 = vmax.f32 %v908_v33, %v956_v44  ;;  %v1641_v49 = vpop.eup %1640  ;;  %v1091_v28 = vadd.f32 1.0, %v1639_v45  ;;  %v1041_v26 = vadd.f32 %v1040_v29, %v1033_v5  ;;  %v1072_v3 = vsub.f32 %v1064_v47, %v1068_v56 }
  0xff   : > { %v1092_v59 = vadd.f32 1.0, %v1641_v49  ;;  %1644 = vlog2.f32 %v1090_v48 }
 0x100   : > { %vm958_vm13 = vcmp.le.f32.partialorder %v957_v7, 0.5  ;;  %1646 = vlog2.f32 %v1091_v28 }
 0x101   : > { %v1483_v60 = vsel %vm958_vm13, 1.0, %v1932_v18  ;;  %1648 = vlog2.f32 %v1092_v59 }
 0x102   : > { %v961_v53 = vmul.f32 %v1483_v60, %v1408_v50 }
 0x103   : > { %v1643_v62 = vpop.eup %1642 }
 0x104   : > { %v1042_v57 = vadd.f32 %v2908_v25, %v961_v53  ;;  %v1094_v18 = vmul.f32 0.6931472, %v1643_v62 }
 0x105   : > { %v1645_v63 = vpop.eup %1644 }
 0x106   : > { %v1043_v41 = vmul.f32 %v1042_v57, %v1041_v26  ;;  %v1647_v11 = vpop.eup %1646  ;;  %v1096_v4 = vmul.f32 0.6931472, %v1645_v63  ;;  %v1101_v2 = vadd.f32 %v1094_v18, %v1069_v61 }
 0x107   : > { %v1649_v1 = vpop.eup %1648  ;;  %v1098_v54 = vmul.f32 0.6931472, %v1647_v11 }
 0x108   : > { %1044 = vadd.xlane.f32.xlu2 %v1043_v41  ;;  %v1100_v6 = vmul.f32 0.6931472, %v1649_v1  ;;  %v1102_v8 = vadd.f32 %v1096_v4, %v1070_v42  ;;  %v1105_v14 = vmul.f32 %v2908_v25, %v1101_v2 }
 0x109   : > { %v1103_v9 = vadd.f32 %v1098_v54, %v1071_v0 }
 0x10a   : > { %v1104_v10 = vadd.f32 %v1100_v6, %v1072_v3  ;;  %v1106_v12 = vmul.f32 %v2908_v25, %v1102_v8 }
 0x10b   : > { %v1107_v13 = vmul.f32 %v2908_v25, %v1103_v9  ;;  %v1011_v40 = vpop.xlane.xlu1 %1010 }
 0x10c   : > { %v1108_v23 = vmul.f32 %v2908_v25, %v1104_v10  ;;  %v1109_v19 = vadd.f32 %v1106_v12, %v1105_v14  ;;  %v1012_v5 = vrot.slane %v1011_v40, 4 }
 0x10e   : > { %v1110_v27 = vadd.f32 %v1109_v19, %v1107_v13 }
 0x110   : > { %v1111_v20 = vadd.f32 %v1110_v27, %v1108_v23 }
 0x112   : > { %1112 = vadd.xlane.f32.xlu2 %v1111_v20 }
 0x113   : > { %v1023_v44 = vpop.xlane.xlu1 %1022 }
 0x114   : > { %v1024_v45 = vrot.slane %v1023_v44, 4 }
 0x11e   : > { %v978_v16 = vpop.xlane.xlu0 %977 }
 0x11f   : > { %v979_v52 = vrot.slane %v978_v16, 4 }
 0x121   : > { %v980_v21 = vadd.f32 %v979_v52, %v978_v16 }
 0x123   : > { %v981_v51 = vrot.slane %v980_v21, 2 }
 0x125   : > { %v982_v22 = vadd.f32 %v981_v51, %v980_v21 }
 0x126   : > { %v999_v32 = vpop.xlane.xlu0 %998 }
 0x127   : > { %v1000_v33 = vrot.slane %v999_v32, 4  ;;  %v983_v35 = vrot.slane %v982_v22, 1 }
 0x129   : > { %v1001_v36 = vadd.f32 %v1000_v33, %v999_v32  ;;  %v984_v37 = vadd.f32 %v983_v35, %v982_v22 }
 0x12b   : > { %v1002_v38 = vrot.slane %v1001_v36, 2  ;;  %1493 = vpush %v984_v37 }
 0x12d   : > { %v1003_v25 = vadd.f32 %v1002_v38, %v1001_v36 }
 0x12f   : > { %v1004_v39 = vrot.slane %v1003_v25, 1 }
 0x131   : > { %v1005_v17 = vadd.f32 %v1004_v39, %v1003_v25 }
 0x133   : > { %1495 = vpush %v1005_v17 }
 0x134   : > { %1843 = shalt.err (!%p1840_p11)
}
 0x135   : > { %s1933_s10 = smov 128   ;;  %s1934_s21 = smov 256   ;;  %v1013_v7 = vadd.f32 %v1012_v5, %v1011_v40  ;;  %v1025_v29 = vadd.f32 %v1024_v45, %v1023_v44 }
 0x136   : > { %s1935_s4 = smov 8   ;;  %s3117_s7 = sld [smem:[#allocation31_spill]] }
 0x137   : > { %1520 = dma.vmem_to_hbm [thread:$0]  (%p2097_p7), %s1179_s20, 1024, %s1181_s0, %s1153_s22, %s1933_s10, %s1934_s21, %s1935_s4   ;;  %v1014_v46 = vrot.slane %v1013_v7, 2  ;;  %v1026_v48 = vrot.slane %v1025_v29, 2 }
 0x138   : > { %s1165_s29 = sshll.u32 %s2783_s23, 4  ;;  %s1166_s29 = int_to_ptr.vmem [resolvable:$true] %s1165_s29 }
 0x139   : > { %v1027_v49 = vadd.f32 %v1026_v48, %v1025_v29  ;;  %v1015_v50 = vadd.f32 %v1014_v46, %v1013_v7 }
 0x13b   : > { %v1016_v55 = vrot.slane %v1015_v50, 1  ;;  %v1028_v24 = vrot.slane %v1027_v49, 1 }
 0x13c   : > { %s1163_s28 = scalar_lea.hbm %s3117_s7, %s1486_s17 }
 0x13d   : > { %v1017_v15 = vadd.f32 %v1016_v55, %v1015_v50  ;;  %v1029_v28 = vadd.f32 %v1028_v24, %v1027_v49  ;;  %s1167_s21 = sshll.u32 %s1163_s28, 4  ;;  %s1168_s21 = int_to_ptr.hbm [resolvable:$true] %s1167_s21 }
 0x13e   : > { %s1858_s2 = sshra.s32 %s1168_s21, 4  ;;  %s1859_s2 = int_to_ptr.hbm [resolvable:$true] %s1858_s2 }
 0x13f   : > { %1497 = vpush %v1017_v15  ;;  %p1865_p12 = scmp.lt.s32.totalorder %s1859_s2, %s3117_s7 }
 0x140   : > { %1499 = vpush %v1029_v28 }
 0x15c   : > { %s1494_s26 = spop %1493 }
 0x15d   : > { %s1121_s14 = smul.f32 0.5, %s1494_s26 }
 0x15f   : > { %v1134_v30 = vstv %s1121_s14 }
 0x160   : > { %1135 = vst [vmem:[%s2783_s23 + $0x1] sm:$0x1] %v1134_v30 }
 0x164   : > { %s1496_s18 = spop %1495 }
 0x165   : > { %s1122_s27 = smul.f32 0.5, %s1496_s18  ;;  %s1148_s18 = scalar_lea.sflag [#allocation4], %s2184_s9 }
 0x167   : > { %s2955_s11 = sadd.f32 %s1122_s27, %s1121_s14  ;;  %v1136_v34 = vstv %s1122_s27  ;;  %s1860_s27 = scalar_lea.hbm %s1859_s2, 8 }
 0x168   : > { %1137 = vst [vmem:[%s2783_s23 + $0x2] sm:$0x1] %v1136_v34  ;;  %p1861_p0 = scmp.ne.s32.totalorder %s1859_s2, %s1860_s27 }
 0x16a   : > { %p1862_p3 = pnand %p1861_p0, %p2097_p7 }
 0x16c   : > { %p1863_p13 = pneg %p1862_p3 }
 0x170   : > { %s1498_s16 = spop %1497 }
 0x171   : > { %s1123_s24 = smul.f32 0.25, %s1498_s16  ;;  %s1500_s6 = spop %1499 }
 0x172   : > { %s1124_s0 = smul.f32 0.25, %s1500_s6  ;;  %s1864_s16 = scalar_lea.hbm %s3117_s7, 16 }
 0x173   : > { %v1138_v63 = vstv %s1123_s24  ;;  %s1128_s8 = sadd.f32 %s2955_s11, %s1123_s24  ;;  %p1866_p1 = scmp.lt.s32.totalorder %s1864_s16, %s1860_s27 }
 0x174   : > { %1139 = vst [vmem:[%s2783_s23 + $0x3] sm:$0x1] %v1138_v63  ;;  %v1140_v41 = vstv %s1124_s0 }
 0x175   : > { %1141 = vst [vmem:[%s2783_s23 + $0x4] sm:$0x1] %v1140_v41  ;;  %s1129_s12 = sadd.f32 %s1128_s8, %s1124_s0  ;;  %p1867_p2 = por %p1866_p1, %p1865_p12 }
 0x177   : > { %p1868_p5 = pnand %p1867_p2, %p1863_p13 }
 0x17b   : > { %v1045_v59 = vpop.xlane.xlu2 %1044 }
 0x17c   : > { %v1046_v60 = vrot.slane %v1045_v59, 4 }
 0x17e   : > { %v1047_v58 = vadd.f32 %v1046_v60, %v1045_v59 }
 0x180   : > { %v1048_v31 = vrot.slane %v1047_v58, 2 }
 0x182   : > { %v1049_v53 = vadd.f32 %v1048_v31, %v1047_v58 }
 0x184   : > { %v1050_v26 = vrot.slane %v1049_v53, 1 }
 0x185   : > { %v1113_v43 = vpop.xlane.xlu2 %1112 }
 0x186   : > { %v1051_v47 = vadd.f32 %v1050_v26, %v1049_v53  ;;  %v1114_v56 = vrot.slane %v1113_v43, 4 }
 0x188   : > { %1501 = vpush %v1051_v47  ;;  %v1115_v61 = vadd.f32 %v1114_v56, %v1113_v43 }
 0x18a   : > { %v1116_v62 = vrot.slane %v1115_v61, 2 }
 0x18c   : > { %v1117_v57 = vadd.f32 %v1116_v62, %v1115_v61 }
 0x18e   : > { %v1118_v42 = vrot.slane %v1117_v57, 1 }
 0x190   : > { %v1119_v18 = vadd.f32 %v1118_v42, %v1117_v57 }
 0x192   : > { %1503 = vpush %v1119_v18 }
 0x1b9   : > { %s1502_s20 = spop %1501 }
 0x1ba   : > { %s1125_s22 = smul.f32 0.5, %s1502_s20 }
 0x1bc   : > { %v1142_v0 = vstv %s1125_s22  ;;  %s1130_s4 = sadd.f32 %s1129_s12, %s1125_s22 }
 0x1bd   : > { %1143 = vst [vmem:[%s2783_s23 + $0x5] sm:$0x1] %v1142_v0 }
 0x1c3   : > { %s1504_s10 = spop %1503 }
 0x1c4   : > { %s1126_s26 = smul.f32 0.5, %s1504_s10 }
 0x1c6   : > { %s1131_s14 = sadd.f32 %s1130_s4, %s1126_s26  ;;  %v1144_v11 = vstv %s1126_s26 }
 0x1c7   : > { %1145 = vst [vmem:[%s2783_s23 + $0x6] sm:$0x1] %v1144_v11 }
 0x1c8   : > { %v1132_v3 = vstv %s1131_s14 }
 0x1c9   : > { %1133 = vst [vmem:[%s2783_s23] sm:$0x1] %v1132_v3 }
 0x1ca   : > { %1871 = shalt.err (!%p1868_p5)
}
 0x1cb   : > { %1519 = dma.vmem_to_hbm [thread:$0]  (%p2097_p7), %s1166_s29, 128, %s1168_s21, %s1148_s18  }
 0x1cc PF: > { %s3118_s9 = sld [smem:[#allocation22_spill]] }
 0x1cd   : > { %s3120_s0 = sld [smem:[#allocation24_spill]] }
 0x1d2   : > { %s1195_s20 = sand.u32 1, %s3118_s9  }
 0x1d3   : > { %p3121_p8 = scmp.ge.s32.totalorder %s3120_s0, 2  ;;  %s1196_s22 = scalar_lea.sflag [#allocation4], %s1195_s20 }
 0x1d5   : > { %p1544_p10 = pnand %p3121_p8, %p2101_p9 }
 0x1d7   : > { %p1545_p6 = pneg %p1544_p10 }
 0x1d9   : > { %1905 = dma.done.wait (%p1545_p6), %s1196_s22, 128  }
 0x1da   : > { %1907 = vsyncadd (%p1545_p6), %s1196_s22, 4294967168  ;;  %s1206_s8 = scalar_lea.sflag [#allocation15], %s1195_s20 }
 0x1db   : > { %1909 = dma.done.wait (%p1545_p6), %s1206_s8, 1024  }
 0x1dc   : > { %1911 = vsyncadd (%p1545_p6), %s1206_s8, 4294966272  ;;  %s3122_s27 = sld [smem:[#allocation25_spill]]  ;;  %s3125_s24 = smov %s1918_s25 }
 0x1dd   : > { %s3123_s19 = sld [smem:[#allocation23_spill]] }
 0x1de   : > { %s3124_s26 = sld [smem:[#allocation26_spill]] }
 0x1e2   : > { %p31_p7 = scmp.ge.s32.totalorder %s3122_s27, 4  }
 0x1e3   : > { %s3126_s25 = smov %s3123_s19 }
 0x1e4   :  { %33 = sbr.rel (!%p31_p7) target bundleno = 18 (0x12), region = 181 }
 0x1e9   :  { %1212 = vsyncpa [#allocation3], 1 }
 0x1ea   :  { %1214 = vsyncpa [#allocation3 + $0x1], 1 }
 0x1eb   :  { %1215 = vsyncpa [#allocation8], 1 }
 0x1ec   :  { %1217 = vsyncpa [#allocation8 + $0x1], 1 }
 0x1ed   :  { %1218 = vsyncpa [#allocation11], 1 }
 0x1ee   :  { %1220 = vsyncpa [#allocation11 + $0x1], 1 }
 0x1ef   :  { %1221 = vsyncpa [#allocation4], 1 }
 0x1f0   :  { %1223 = vsyncpa [#allocation4 + $0x1], 1 }
 0x1f1   :  { %1224 = vsyncpa [#allocation15], 1 }
 0x1f2   :  { %1226 = vsyncpa [#allocation15 + $0x1], 1 }
 0x1f3   :  { %1227 = vsyncpa [#allocation5], 1 }
 0x1f4   :  { %1229 = vsyncpa [#allocation5 + $0x1], 1 }

</bundles_post_ra>
